<compile_context>
chip_gen: v6e
topology: v6e:2x2x1
jax: 0.10.0
libtpu: 0.0.40
codegen_flags: <defaults>
</compile_context>

<pallas_src>
import functools
import math

import jax
import jax.numpy as jnp
from jax.experimental import pallas as pl
from jax.experimental.pallas import tpu as pltpu

LANE = 128
# Conservative cross-generation VMEM budget: v7x has only 64 MiB physical
# per-TensorCore VMEM, so cap the scoped limit at 48 MiB; v5e/v6e (128 MiB)
# have ample headroom.  Actual per-step footprint is only a few MiB.
VMEM_LIMIT = 48 * 1024 * 1024


# ---------------------------------------------------------------------------
# Padding / tiling helpers (host-side, run once at prepare time)
# ---------------------------------------------------------------------------
def _round_up(x, m):
    return ((x + m - 1) // m) * m


def _pad_to(arr, shape):
    widths = [(0, t - s) for s, t in zip(arr.shape, shape)]
    if all(w == (0, 0) for w in widths):
        return arr
    return jnp.pad(arr, widths)


def _choose_node_tiling(n):
    """Pad node axis to a multiple of 256 and pick (block_rows, block_k).

    block_rows is the HBM-traffic lever (support re-reads scale with
    N/block_rows) so it is made as large as possible up to 512, but at
    least 2 row tiles are kept so the parallel axis can shard across both
    v7x TensorCores.  block_k (contraction tile) goes up to 1024.
    """
    n_pad = _round_up(max(n, 256), 256)
    if n_pad % 512 == 0 and n_pad // 512 >= 2:
        block_rows = 512
    elif n_pad // 256 >= 2:
        block_rows = 256
    else:                       # n_pad == 256 (demo-sized): keep 2 row tiles
        block_rows = n_pad // 2
    block_k = n_pad
    for cand in (1024, 512, 256, 128):
        if n_pad % cand == 0:
            block_k = cand
            break
    return n_pad, block_rows, block_k


def _largest_divisor_tile(dim):
    """Largest contraction tile (<=1024) dividing a lane-padded dimension."""
    for cand in (1024, 512, 256, 128):
        if dim % cand == 0:
            return cand
    return dim


# ---------------------------------------------------------------------------
# Kernel 1: support = x @ W   (row-parallel, K-tiled, bf16 MXU, f32 acc)
# ---------------------------------------------------------------------------
def _support_kernel(x_ref, w_ref, out_ref, acc_ref):
    k = pl.program_id(1)

    @pl.when(k == 0)
    def _init():
        acc_ref[...] = jnp.zeros_like(acc_ref)

    acc_ref[...] += jnp.dot(x_ref[...], w_ref[...],
                            preferred_element_type=jnp.float32)

    @pl.when(k == pl.num_programs(1) - 1)
    def _finalize():
        out_ref[...] = acc_ref[...].astype(out_ref.dtype)


def dense_support(x, w, *, block_rows, block_f, out_dtype):
    n, f_in = x.shape
    f_out = w.shape[1]
    return pl.pallas_call(
        _support_kernel,
        out_shape=jax.ShapeDtypeStruct((n, f_out), out_dtype),
        grid_spec=pltpu.PrefetchScalarGridSpec(
            num_scalar_prefetch=0,
            grid=(n // block_rows, f_in // block_f),
            in_specs=[
                pl.BlockSpec((block_rows, block_f), lambda i, k: (i, k)),
                pl.BlockSpec((block_f, f_out), lambda i, k: (k, 0)),
            ],
            out_specs=pl.BlockSpec((block_rows, f_out), lambda i, k: (i, 0)),
            scratch_shapes=[pltpu.VMEM((block_rows, f_out), jnp.float32)],
        ),
        compiler_params=pltpu.CompilerParams(
            dimension_semantics=("parallel", "arbitrary"),
            vmem_limit_bytes=VMEM_LIMIT,
        ),
        cost_estimate=pl.CostEstimate(
            flops=2 * n * f_in * f_out,
            transcendentals=0,
            bytes_accessed=(x.size * x.dtype.itemsize
                            + (n // block_rows) * w.size * w.dtype.itemsize
                            + n * f_out * jnp.dtype(out_dtype).itemsize),
        ),
    )(x, w)


# ---------------------------------------------------------------------------
# Kernel 2 (layer 1): h = relu(adj_1 @ support + b1)
#   Tiled over (row tiles i, contraction tiles k) with f32 VMEM accumulator.
# ---------------------------------------------------------------------------
def _aggregate_relu_kernel(adj_ref, sup_ref, b_ref, out_ref, acc_ref):
    k = pl.program_id(1)

    @pl.when(k == 0)
    def _init():
        acc_ref[...] = jnp.zeros_like(acc_ref)

    acc_ref[...] += jnp.dot(adj_ref[...], sup_ref[...],
                            preferred_element_type=jnp.float32)

    @pl.when(k == pl.num_programs(1) - 1)
    def _finalize():
        y = acc_ref[...] + b_ref[...].astype(jnp.float32)
        out_ref[...] = jnp.maximum(y, 0.0).astype(out_ref.dtype)


def graph_aggregate_relu(adj, support, bias, *, block_rows, block_k,
                         out_dtype):
    n = adj.shape[0]
    f_out = support.shape[1]
    return pl.pallas_call(
        _aggregate_relu_kernel,
        out_shape=jax.ShapeDtypeStruct((n, f_out), out_dtype),
        grid_spec=pltpu.PrefetchScalarGridSpec(
            num_scalar_prefetch=0,
            grid=(n // block_rows, n // block_k),
            in_specs=[
                pl.BlockSpec((block_rows, block_k), lambda i, k: (i, k)),
                pl.BlockSpec((block_k, f_out), lambda i, k: (k, 0)),
                pl.BlockSpec((1, f_out), lambda i, k: (0, 0)),
            ],
            out_specs=pl.BlockSpec((block_rows, f_out), lambda i, k: (i, 0)),
            scratch_shapes=[pltpu.VMEM((block_rows, f_out), jnp.float32)],
        ),
        compiler_params=pltpu.CompilerParams(
            dimension_semantics=("parallel", "arbitrary"),
            vmem_limit_bytes=VMEM_LIMIT,
        ),
        cost_estimate=pl.CostEstimate(
            flops=2 * n * n * f_out,
            transcendentals=0,
            bytes_accessed=(adj.size * adj.dtype.itemsize
                            + (n // block_rows) * support.size
                            * support.dtype.itemsize
                            + n * f_out * jnp.dtype(out_dtype).itemsize),
        ),
    )(adj, support, bias)


# ---------------------------------------------------------------------------
# Kernel 3 (layer 2, fused): out = log_softmax(adj_2 @ (h @ W2) + b2, dim=1)
#   W2 stays VMEM-resident (constant index_map -> fetched once); the support
#   k-tile is recomputed on the fly so s2 never touches HBM.
# ---------------------------------------------------------------------------
def _aggregate_fused_lsm_kernel(adj_ref, h_ref, w_ref, b_ref, out_ref,
                                acc_ref, *, nclass):
    k = pl.program_id(1)

    @pl.when(k == 0)
    def _init():
        acc_ref[...] = jnp.zeros_like(acc_ref)

    sup = jnp.dot(h_ref[...], w_ref[...],
                  preferred_element_type=jnp.float32).astype(jnp.bfloat16)
    acc_ref[...] += jnp.dot(adj_ref[...], sup,
                            preferred_element_type=jnp.float32)

    @pl.when(k == pl.num_programs(1) - 1)
    def _finalize():
        y = acc_ref[...] + b_ref[...].astype(jnp.float32)
        col = jax.lax.broadcasted_iota(jnp.int32, y.shape, 1)
        valid = col < nclass
        y_masked = jnp.where(valid, y, jnp.float32(-1e30))
        m = jnp.max(y_masked, axis=1, keepdims=True)
        shifted = y - m
        expv = jnp.where(valid, jnp.exp(shifted), jnp.float32(0.0))
        lse = jnp.log(jnp.sum(expv, axis=1, keepdims=True))
        # Zero padded class lanes so the padded buffer is safe to read.
        out_ref[...] = jnp.where(valid, shifted - lse,
                                 jnp.float32(0.0)).astype(out_ref.dtype)


def graph_aggregate_fused_lsm(adj, h, w, bias, *, block_rows, block_k,
                              nclass, out_dtype):
    n = adj.shape[0]
    kdim = h.shape[1]
    f_out = w.shape[1]
    kernel = functools.partial(_aggregate_fused_lsm_kernel, nclass=nclass)
    return pl.pallas_call(
        kernel,
        out_shape=jax.ShapeDtypeStruct((n, f_out), out_dtype),
        grid_spec=pltpu.PrefetchScalarGridSpec(
            num_scalar_prefetch=0,
            grid=(n // block_rows, n // block_k),
            in_specs=[
                pl.BlockSpec((block_rows, block_k), lambda i, k: (i, k)),
                pl.BlockSpec((block_k, kdim), lambda i, k: (k, 0)),
                pl.BlockSpec((kdim, f_out), lambda i, k: (0, 0)),  # resident
                pl.BlockSpec((1, f_out), lambda i, k: (0, 0)),
            ],
            out_specs=pl.BlockSpec((block_rows, f_out), lambda i, k: (i, 0)),
            scratch_shapes=[pltpu.VMEM((block_rows, f_out), jnp.float32)],
        ),
        compiler_params=pltpu.CompilerParams(
            dimension_semantics=("parallel", "arbitrary"),
            vmem_limit_bytes=VMEM_LIMIT,
        ),
        cost_estimate=pl.CostEstimate(
            flops=(2 * n * n * f_out
                   + 2 * (n // block_rows) * n * kdim * f_out),
            transcendentals=n * f_out,
            bytes_accessed=(adj.size * adj.dtype.itemsize
                            + (n // block_rows) * h.size * h.dtype.itemsize
                            + w.size * w.dtype.itemsize
                            + n * f_out * jnp.dtype(out_dtype).itemsize),
        ),
    )(adj, h, w, bias)


# ---------------------------------------------------------------------------
# Input preparation (run ONCE, outside the jitted forward): cast to bf16
# BEFORE padding, then zero-pad to hardware-friendly sizes.
# ---------------------------------------------------------------------------
def prepare_inputs(x, adj_1, adj_2, w1, b1, w2, b2):
    n, f_in = x.shape
    nhid = w1.shape[1]
    nclass = w2.shape[1]

    n_pad, block_rows, block_k = _choose_node_tiling(n)
    f_in_pad = _round_up(f_in, LANE)
    nhid_pad = _round_up(nhid, LANE)
    ncls_pad = _round_up(nclass, LANE)

    xb = _pad_to(x.astype(jnp.bfloat16), (n_pad, f_in_pad))
    a1b = _pad_to(adj_1.astype(jnp.bfloat16), (n_pad, n_pad))
    a2b = _pad_to(adj_2.astype(jnp.bfloat16), (n_pad, n_pad))
    # Note: bf16 adjacency gives ~0.4% per-element error (f32 accumulation
    # bounds the total); keep adj in f32 if tighter parity is ever required.
    w1b = _pad_to(w1.astype(jnp.bfloat16), (f_in_pad, nhid_pad))
    w2b = _pad_to(w2.astype(jnp.bfloat16), (nhid_pad, ncls_pad))
    b1p = _pad_to(b1.astype(jnp.float32), (1, nhid_pad))
    b2p = _pad_to(b2.astype(jnp.float32), (1, ncls_pad))

    arrays = (xb, a1b, a2b, w1b, b1p, w2b, b2p)
    meta = dict(n=n, nclass=nclass, block_rows=block_rows, block_k=block_k)
    return arrays, meta


# ---------------------------------------------------------------------------
# Full GCN_modified forward on pre-padded bf16 inputs.
# ---------------------------------------------------------------------------
def gcn_forward_padded(xb, a1b, a2b, w1b, b1p, w2b, b2p, *,
                       n, nclass, block_rows, block_k):
    f_in_pad = xb.shape[1]

    # Layer 1: h = relu(adj_1 @ (x @ W1) + b1)
    s1 = dense_support(xb, w1b, block_rows=block_rows,
                       block_f=_largest_divisor_tile(f_in_pad),
                       out_dtype=jnp.bfloat16)
    h = graph_aggregate_relu(a1b, s1, b1p, block_rows=block_rows,
                             block_k=block_k, out_dtype=jnp.bfloat16)

    # Dropout: module evaluated in inference mode -> F.dropout is identity.
    # TODO(synk): training-mode dropout via pltpu.prng_seed/prng_random_bits
    # in the layer-1 finalize if a training forward is ever required.

    # Layer 2 (fused): out = log_softmax(adj_2 @ (h @ W2) + b2, dim=1)
    out = graph_aggregate_fused_lsm(a2b, h, w2b, b2p, block_rows=block_rows,
                                    block_k=block_k, nclass=nclass,
                                    out_dtype=jnp.float32)

    # Slice back to valid node rows / classes.
    return out[:n, :nclass]


def init_graph_conv_params(key, in_features, out_features):
    """Matches pygcn GraphConvolution.reset_parameters: U(-stdv, stdv)."""
    stdv = 1.0 / math.sqrt(out_features)
    k_w, k_b = jax.random.split(key)
    w = jax.random.uniform(k_w, (in_features, out_features), jnp.float32,
                           minval=-stdv, maxval=stdv)
    b = jax.random.uniform(k_b, (1, out_features), jnp.float32,
                           minval=-stdv, maxval=stdv)
    return w, b


if __name__ == "__main__":
    # Small but hardware-aligned shapes: 256 nodes, 128 in-features,
    # 128 hidden, 8 classes (class axis lane-padded to 128 inside the kernel).
    N, NFEAT, NHID, NCLASS = 256, 128, 128, 8

    key = jax.random.PRNGKey(0)
    k_x, k_a1, k_a2, k_l1, k_l2 = jax.random.split(key, 5)

    x = jax.random.normal(k_x, (N, NFEAT), jnp.float32)

    # Symmetric, row-normalized dense adjacency matrices with self-loops.
    def make_adj(k):
        a = jax.random.uniform(k, (N, N), jnp.float32)
        a = (a + a.T) * 0.5 + jnp.eye(N, dtype=jnp.float32)
        return a / jnp.sum(a, axis=1, keepdims=True)

    adj_1 = make_adj(k_a1)
    adj_2 = make_adj(k_a2)

    w1, b1 = init_graph_conv_params(k_l1, NFEAT, NHID)
    w2, b2 = init_graph_conv_params(k_l2, NHID, NCLASS)

    # One-time layout prep (cast-before-pad), hoisted out of the jitted fwd.
    prepped, meta = prepare_inputs(x, adj_1, adj_2, w1, b1, w2, b2)
    prepped = jax.block_until_ready(prepped)

    fwd = jax.jit(functools.partial(gcn_forward_padded, **meta))
    out = jax.block_until_ready(fwd(*prepped))

    # Pure-JAX f32 reference for correctness.
    def reference(x, a1, a2, w1, b1, w2, b2):
        h = jnp.maximum(a1 @ (x @ w1) + b1, 0.0)
        logits = a2 @ (h @ w2) + b2
        return jax.nn.log_softmax(logits, axis=1)

    ref = reference(x, adj_1, adj_2, w1, b1, w2, b2)

    assert out.shape == (N, NCLASS)
    row_sums = jnp.exp(out).sum(axis=1)
    assert bool(jnp.all(jnp.abs(row_sums - 1.0) < 1e-3))
    assert bool(jnp.allclose(out, ref, atol=5e-2, rtol=5e-2))

    print("KERNEL_OK")
</pallas_src>

<mosaic_0001>
module attributes {stable_mosaic.version = 11 : i64} {
  func.func @_support_kernel(%arg0: i32, %arg1: i32, %arg2: memref<128x128xbf16, #tpu.memory_space<vmem>>, %arg3: memref<128x128xbf16, #tpu.memory_space<vmem>>, %arg4: memref<128x128xbf16, #tpu.memory_space<vmem>>, %arg5: memref<128x128xf32, #tpu.memory_space<vmem>>) attributes {dimension_semantics = [#tpu.dimension_semantics<parallel>, #tpu.dimension_semantics<arbitrary>], iteration_bounds = array<i64: 2, 1>, scalar_prefetch = 0 : i64, scratch_operands = 1 : i64, tpu.core_type = #tpu.core_type<tc>, window_params = [{transform_indices = @transform_0, window_bounds = array<i64: 128, 128>}, {transform_indices = @transform_1, window_bounds = array<i64: 128, 128>}, {transform_indices = @transform_2, window_bounds = array<i64: 128, 128>}]} {
    %c0_i32 = arith.constant 0 : i32
    %0 = arith.cmpi eq, %arg1, %c0_i32 : i32
    %1 = arith.extui %0 : i1 to i32
    %c0_i32_0 = arith.constant 0 : i32
    %2 = arith.cmpi ne, %1, %c0_i32_0 : i32
    scf.if %2 {
      %cst_10 = arith.constant 0.000000e+00 : f32
      %12 = vector.broadcast %cst_10 : f32 to vector<128x128xf32>
      %c0_11 = arith.constant 0 : index
      %c0_12 = arith.constant 0 : index
      %13 = vector.load %arg5[%c0_11, %c0_12] : memref<128x128xf32, #tpu.memory_space<vmem>>, vector<128x128xf32>
      tpu.vector_store %arg5[%c0_11, %c0_12], %12 {strides = array<i32>} : memref<128x128xf32, #tpu.memory_space<vmem>>, vector<128x128xf32>,
    } else {
    }
    %c0 = arith.constant 0 : index
    %c0_1 = arith.constant 0 : index
    %3 = vector.load %arg5[%c0, %c0_1] : memref<128x128xf32, #tpu.memory_space<vmem>>, vector<128x128xf32>
    %c0_2 = arith.constant 0 : index
    %c0_3 = arith.constant 0 : index
    %4 = vector.load %arg2[%c0_2, %c0_3] : memref<128x128xbf16, #tpu.memory_space<vmem>>, vector<128x128xbf16>
    %c0_4 = arith.constant 0 : index
    %c0_5 = arith.constant 0 : index
    %5 = vector.load %arg3[%c0_4, %c0_5] : memref<128x128xbf16, #tpu.memory_space<vmem>>, vector<128x128xbf16>
    %cst = arith.constant dense<0.000000e+00> : vector<128x128xf32>
    %6 = tpu.matmul %4, %5, %cst {dimension_numbers = #tpu.dot_dimension_numbers<[1], [0], [0], [1], [0, 0, 1, 1], [], []>} : vector<128x128xbf16>, vector<128x128xbf16>, vector<128x128xf32> -> vector<128x128xf32>
    %7 = arith.addf %3, %6 : vector<128x128xf32>
    %c0_6 = arith.constant 0 : index
    %c0_7 = arith.constant 0 : index
    %8 = vector.load %arg5[%c0_6, %c0_7] : memref<128x128xf32, #tpu.memory_space<vmem>>, vector<128x128xf32>
    tpu.vector_store %arg5[%c0_6, %c0_7], %7 {strides = array<i32>} : memref<128x128xf32, #tpu.memory_space<vmem>>, vector<128x128xf32>,
    %c0_i32_8 = arith.constant 0 : i32
    %9 = arith.cmpi eq, %arg1, %c0_i32_8 : i32
    %10 = arith.extui %9 : i1 to i32
    %c0_i32_9 = arith.constant 0 : i32
    %11 = arith.cmpi ne, %10, %c0_i32_9 : i32
    scf.if %11 {
      %c0_10 = arith.constant 0 : index
      %c0_11 = arith.constant 0 : index
      %12 = vector.load %arg5[%c0_10, %c0_11] : memref<128x128xf32, #tpu.memory_space<vmem>>, vector<128x128xf32>
      %13 = arith.truncf %12 : vector<128x128xf32> to vector<128x128xbf16>
      %c0_12 = arith.constant 0 : index
      %c0_13 = arith.constant 0 : index
      %14 = vector.load %arg4[%c0_12, %c0_13] : memref<128x128xbf16, #tpu.memory_space<vmem>>, vector<128x128xbf16>
      tpu.vector_store %arg4[%c0_12, %c0_13], %13 {strides = array<i32>} : memref<128x128xbf16, #tpu.memory_space<vmem>>, vector<128x128xbf16>,
    } else {
    }
    return
  }
  func.func @transform_0(%arg0: i32, %arg1: i32) -> (i32, i32) {
    %c0_i32 = arith.constant 0 : i32
    return %arg0, %arg1 : i32, i32
  }
  func.func @transform_1(%arg0: i32, %arg1: i32) -> (i32, i32) {
    %c0_i32 = arith.constant 0 : i32
    %c0_i32_0 = arith.constant 0 : i32
    return %arg1, %c0_i32 : i32, i32
  }
  func.func @transform_2(%arg0: i32, %arg1: i32) -> (i32, i32) {
    %c0_i32 = arith.constant 0 : i32
    %c0_i32_0 = arith.constant 0 : i32
    return %arg0, %c0_i32 : i32, i32
  }
}

module attributes {stable_mosaic.version = 11 : i64} {
  func.func @_aggregate_fused_lsm_kernel(%arg0: i32, %arg1: i32, %arg2: memref<128x256xbf16, #tpu.memory_space<vmem>>, %arg3: memref<256x128xbf16, #tpu.memory_space<vmem>>, %arg4: memref<128x128xbf16, #tpu.memory_space<vmem>>, %arg5: memref<1x128xf32, #tpu.memory_space<vmem>>, %arg6: memref<128x128xf32, #tpu.memory_space<vmem>>, %arg7: memref<128x128xf32, #tpu.memory_space<vmem>>) attributes {dimension_semantics = [#tpu.dimension_semantics<parallel>, #tpu.dimension_semantics<arbitrary>], iteration_bounds = array<i64: 2, 1>, scalar_prefetch = 0 : i64, scratch_operands = 1 : i64, tpu.core_type = #tpu.core_type<tc>, window_params = [{transform_indices = @transform_0, window_bounds = array<i64: 128, 256>}, {transform_indices = @transform_1, window_bounds = array<i64: 256, 128>}, {pipeline_mode = #tpu.pipeline_mode<synchronous>, transform_indices = @transform_2, window_bounds = array<i64: 128, 128>}, {pipeline_mode = #tpu.pipeline_mode<synchronous>, transform_indices = @transform_3, window_bounds = array<i64: 1, 128>}, {transform_indices = @transform_4, window_bounds = array<i64: 128, 128>}]} {
    %c0_i32 = arith.constant 0 : i32
    %0 = arith.cmpi eq, %arg1, %c0_i32 : i32
    %1 = arith.extui %0 : i1 to i32
    %c0_i32_0 = arith.constant 0 : i32
    %2 = arith.cmpi ne, %1, %c0_i32_0 : i32
    scf.if %2 {
      %cst_13 = arith.constant 0.000000e+00 : f32
      %15 = vector.broadcast %cst_13 : f32 to vector<128x128xf32>
      %c0_14 = arith.constant 0 : index
      %c0_15 = arith.constant 0 : index
      %16 = vector.load %arg7[%c0_14, %c0_15] : memref<128x128xf32, #tpu.memory_space<vmem>>, vector<128x128xf32>
      tpu.vector_store %arg7[%c0_14, %c0_15], %15 {strides = array<i32>} : memref<128x128xf32, #tpu.memory_space<vmem>>, vector<128x128xf32>,
    } else {
    }
    %c0 = arith.constant 0 : index
    %c0_1 = arith.constant 0 : index
    %3 = vector.load %arg3[%c0, %c0_1] : memref<256x128xbf16, #tpu.memory_space<vmem>>, vector<256x128xbf16>
    %c0_2 = arith.constant 0 : index
    %c0_3 = arith.constant 0 : index
    %4 = vector.load %arg4[%c0_2, %c0_3] : memref<128x128xbf16, #tpu.memory_space<vmem>>, vector<128x128xbf16>
    %cst = arith.constant dense<0.000000e+00> : vector<256x128xf32>
    %5 = tpu.matmul %3, %4, %cst {dimension_numbers = #tpu.dot_dimension_numbers<[1], [0], [0], [1], [0, 0, 1, 1], [], []>} : vector<256x128xbf16>, vector<128x128xbf16>, vector<256x128xf32> -> vector<256x128xf32>
    %6 = arith.truncf %5 : vector<256x128xf32> to vector<256x128xbf16>
    %c0_4 = arith.constant 0 : index
    %c0_5 = arith.constant 0 : index
    %7 = vector.load %arg7[%c0_4, %c0_5] : memref<128x128xf32, #tpu.memory_space<vmem>>, vector<128x128xf32>
    %c0_6 = arith.constant 0 : index
    %c0_7 = arith.constant 0 : index
    %8 = vector.load %arg2[%c0_6, %c0_7] : memref<128x256xbf16, #tpu.memory_space<vmem>>, vector<128x256xbf16>
    %cst_8 = arith.constant dense<0.000000e+00> : vector<128x128xf32>
    %9 = tpu.matmul %8, %6, %cst_8 {dimension_numbers = #tpu.dot_dimension_numbers<[1], [0], [0], [1], [0, 0, 1, 1], [], []>} : vector<128x256xbf16>, vector<256x128xbf16>, vector<128x128xf32> -> vector<128x128xf32>
    %10 = arith.addf %7, %9 : vector<128x128xf32>
    %c0_9 = arith.constant 0 : index
    %c0_10 = arith.constant 0 : index
    %11 = vector.load %arg7[%c0_9, %c0_10] : memref<128x128xf32, #tpu.memory_space<vmem>>, vector<128x128xf32>
    tpu.vector_store %arg7[%c0_9, %c0_10], %10 {strides = array<i32>} : memref<128x128xf32, #tpu.memory_space<vmem>>, vector<128x128xf32>,
    %c0_i32_11 = arith.constant 0 : i32
    %12 = arith.cmpi eq, %arg1, %c0_i32_11 : i32
    %13 = arith.extui %12 : i1 to i32
    %c0_i32_12 = arith.constant 0 : i32
    %14 = arith.cmpi ne, %13, %c0_i32_12 : i32
    scf.if %14 {
      %c0_13 = arith.constant 0 : index
      %c0_14 = arith.constant 0 : index
      %15 = vector.load %arg7[%c0_13, %c0_14] : memref<128x128xf32, #tpu.memory_space<vmem>>, vector<128x128xf32>
      %c0_15 = arith.constant 0 : index
      %c0_16 = arith.constant 0 : index
      %16 = vector.load %arg5[%c0_15, %c0_16] : memref<1x128xf32, #tpu.memory_space<vmem>>, vector<1x128xf32>
      %17 = vector.broadcast %16 : vector<1x128xf32> to vector<128x128xf32>
      %18 = arith.addf %15, %17 : vector<128x128xf32>
      %19 = tpu.iota {dimensions = array<i32: 1>} : vector<128x128xi32>
      %c8_i32 = arith.constant 8 : i32
      %20 = vector.broadcast %c8_i32 : i32 to vector<128x128xi32>
      %21 = arith.cmpi slt, %19, %20 : vector<128x128xi32>
      %cst_17 = arith.constant -1.000000e+30 : f32
      %22 = vector.broadcast %cst_17 : f32 to vector<128x128xf32>
      %23 = arith.select %21, %18, %22 : vector<128x128xi1>, vector<128x128xf32>
      %cst_18 = arith.constant dense<0xFF800000> : vector<128xf32>
      %24 = vector.multi_reduction <maximumf>, %23, %cst_18 [1] : vector<128x128xf32> to vector<128xf32>
      %25 = vector.shape_cast %24 : vector<128xf32> to vector<128x1xf32>
      %26 = vector.broadcast %25 : vector<128x1xf32> to vector<128x128xf32>
      %27 = arith.subf %18, %26 : vector<128x128xf32>
      %28 = math.exp %27 : vector<128x128xf32>
      %cst_19 = arith.constant 0.000000e+00 : f32
      %29 = vector.broadcast %cst_19 : f32 to vector<128x128xf32>
      %30 = arith.select %21, %28, %29 : vector<128x128xi1>, vector<128x128xf32>
      %cst_20 = arith.constant dense<0.000000e+00> : vector<128xf32>
      %31 = vector.multi_reduction <add>, %30, %cst_20 [1] : vector<128x128xf32> to vector<128xf32>
      %32 = vector.shape_cast %31 : vector<128xf32> to vector<128x1xf32>
      %33 = math.log %32 : vector<128x1xf32>
      %34 = vector.broadcast %33 : vector<128x1xf32> to vector<128x128xf32>
      %35 = arith.subf %27, %34 : vector<128x128xf32>
      %cst_21 = arith.constant 0.000000e+00 : f32
      %36 = vector.broadcast %cst_21 : f32 to vector<128x128xf32>
      %37 = arith.select %21, %35, %36 : vector<128x128xi1>, vector<128x128xf32>
      %c0_22 = arith.constant 0 : index
      %c0_23 = arith.constant 0 : index
      %38 = vector.load %arg6[%c0_22, %c0_23] : memref<128x128xf32, #tpu.memory_space<vmem>>, vector<128x128xf32>
      tpu.vector_store %arg6[%c0_22, %c0_23], %37 {strides = array<i32>} : memref<128x128xf32, #tpu.memory_space<vmem>>, vector<128x128xf32>,
    } else {
    }
    return
  }
  func.func @transform_0(%arg0: i32, %arg1: i32) -> (i32, i32) {
    %c0_i32 = arith.constant 0 : i32
    return %arg0, %arg1 : i32, i32
  }
  func.func @transform_1(%arg0: i32, %arg1: i32) -> (i32, i32) {
    %c0_i32 = arith.constant 0 : i32
    %c0_i32_0 = arith.constant 0 : i32
    return %arg1, %c0_i32 : i32, i32
  }
  func.func @transform_2(%arg0: i32, %arg1: i32) -> (i32, i32) {
    %c0_i32 = arith.constant 0 : i32
    %c0_i32_0 = arith.constant 0 : i32
    %c0_i32_1 = arith.constant 0 : i32
    return %c0_i32, %c0_i32_0 : i32, i32
  }
  func.func @transform_3(%arg0: i32, %arg1: i32) -> (i32, i32) {
    %c0_i32 = arith.constant 0 : i32
    %c0_i32_0 = arith.constant 0 : i32
    %c0_i32_1 = arith.constant 0 : i32
    return %c0_i32, %c0_i32_0 : i32, i32
  }
  func.func @transform_4(%arg0: i32, %arg1: i32) -> (i32, i32) {
    %c0_i32 = arith.constant 0 : i32
    %c0_i32_0 = arith.constant 0 : i32
    return %arg0, %c0_i32 : i32, i32
  }
}

module attributes {stable_mosaic.version = 11 : i64} {
  func.func @_aggregate_relu_kernel(%arg0: i32, %arg1: i32, %arg2: memref<128x256xbf16, #tpu.memory_space<vmem>>, %arg3: memref<256x128xbf16, #tpu.memory_space<vmem>>, %arg4: memref<1x128xf32, #tpu.memory_space<vmem>>, %arg5: memref<128x128xbf16, #tpu.memory_space<vmem>>, %arg6: memref<128x128xf32, #tpu.memory_space<vmem>>) attributes {dimension_semantics = [#tpu.dimension_semantics<parallel>, #tpu.dimension_semantics<arbitrary>], iteration_bounds = array<i64: 2, 1>, scalar_prefetch = 0 : i64, scratch_operands = 1 : i64, tpu.core_type = #tpu.core_type<tc>, window_params = [{transform_indices = @transform_0, window_bounds = array<i64: 128, 256>}, {transform_indices = @transform_1, window_bounds = array<i64: 256, 128>}, {pipeline_mode = #tpu.pipeline_mode<synchronous>, transform_indices = @transform_2, window_bounds = array<i64: 1, 128>}, {transform_indices = @transform_3, window_bounds = array<i64: 128, 128>}]} {
    %c0_i32 = arith.constant 0 : i32
    %0 = arith.cmpi eq, %arg1, %c0_i32 : i32
    %1 = arith.extui %0 : i1 to i32
    %c0_i32_0 = arith.constant 0 : i32
    %2 = arith.cmpi ne, %1, %c0_i32_0 : i32
    scf.if %2 {
      %cst_10 = arith.constant 0.000000e+00 : f32
      %12 = vector.broadcast %cst_10 : f32 to vector<128x128xf32>
      %c0_11 = arith.constant 0 : index
      %c0_12 = arith.constant 0 : index
      %13 = vector.load %arg6[%c0_11, %c0_12] : memref<128x128xf32, #tpu.memory_space<vmem>>, vector<128x128xf32>
      tpu.vector_store %arg6[%c0_11, %c0_12], %12 {strides = array<i32>} : memref<128x128xf32, #tpu.memory_space<vmem>>, vector<128x128xf32>,
    } else {
    }
    %c0 = arith.constant 0 : index
    %c0_1 = arith.constant 0 : index
    %3 = vector.load %arg6[%c0, %c0_1] : memref<128x128xf32, #tpu.memory_space<vmem>>, vector<128x128xf32>
    %c0_2 = arith.constant 0 : index
    %c0_3 = arith.constant 0 : index
    %4 = vector.load %arg2[%c0_2, %c0_3] : memref<128x256xbf16, #tpu.memory_space<vmem>>, vector<128x256xbf16>
    %c0_4 = arith.constant 0 : index
    %c0_5 = arith.constant 0 : index
    %5 = vector.load %arg3[%c0_4, %c0_5] : memref<256x128xbf16, #tpu.memory_space<vmem>>, vector<256x128xbf16>
    %cst = arith.constant dense<0.000000e+00> : vector<128x128xf32>
    %6 = tpu.matmul %4, %5, %cst {dimension_numbers = #tpu.dot_dimension_numbers<[1], [0], [0], [1], [0, 0, 1, 1], [], []>} : vector<128x256xbf16>, vector<256x128xbf16>, vector<128x128xf32> -> vector<128x128xf32>
    %7 = arith.addf %3, %6 : vector<128x128xf32>
    %c0_6 = arith.constant 0 : index
    %c0_7 = arith.constant 0 : index
    %8 = vector.load %arg6[%c0_6, %c0_7] : memref<128x128xf32, #tpu.memory_space<vmem>>, vector<128x128xf32>
    tpu.vector_store %arg6[%c0_6, %c0_7], %7 {strides = array<i32>} : memref<128x128xf32, #tpu.memory_space<vmem>>, vector<128x128xf32>,
    %c0_i32_8 = arith.constant 0 : i32
    %9 = arith.cmpi eq, %arg1, %c0_i32_8 : i32
    %10 = arith.extui %9 : i1 to i32
    %c0_i32_9 = arith.constant 0 : i32
    %11 = arith.cmpi ne, %10, %c0_i32_9 : i32
    scf.if %11 {
      %c0_10 = arith.constant 0 : index
      %c0_11 = arith.constant 0 : index
      %12 = vector.load %arg6[%c0_10, %c0_11] : memref<128x128xf32, #tpu.memory_space<vmem>>, vector<128x128xf32>
      %c0_12 = arith.constant 0 : index
      %c0_13 = arith.constant 0 : index
      %13 = vector.load %arg4[%c0_12, %c0_13] : memref<1x128xf32, #tpu.memory_space<vmem>>, vector<1x128xf32>
      %14 = vector.broadcast %13 : vector<1x128xf32> to vector<128x128xf32>
      %15 = arith.addf %12, %14 : vector<128x128xf32>
      %cst_14 = arith.constant 0.000000e+00 : f32
      %16 = vector.broadcast %cst_14 : f32 to vector<128x128xf32>
      %17 = arith.maximumf %15, %16 : vector<128x128xf32>
      %18 = arith.truncf %17 : vector<128x128xf32> to vector<128x128xbf16>
      %c0_15 = arith.constant 0 : index
      %c0_16 = arith.constant 0 : index
      %19 = vector.load %arg5[%c0_15, %c0_16] : memref<128x128xbf16, #tpu.memory_space<vmem>>, vector<128x128xbf16>
      tpu.vector_store %arg5[%c0_15, %c0_16], %18 {strides = array<i32>} : memref<128x128xbf16, #tpu.memory_space<vmem>>, vector<128x128xbf16>,
    } else {
    }
    return
  }
  func.func @transform_0(%arg0: i32, %arg1: i32) -> (i32, i32) {
    %c0_i32 = arith.constant 0 : i32
    return %arg0, %arg1 : i32, i32
  }
  func.func @transform_1(%arg0: i32, %arg1: i32) -> (i32, i32) {
    %c0_i32 = arith.constant 0 : i32
    %c0_i32_0 = arith.constant 0 : i32
    return %arg1, %c0_i32 : i32, i32
  }
  func.func @transform_2(%arg0: i32, %arg1: i32) -> (i32, i32) {
    %c0_i32 = arith.constant 0 : i32
    %c0_i32_0 = arith.constant 0 : i32
    %c0_i32_1 = arith.constant 0 : i32
    return %c0_i32, %c0_i32_0 : i32, i32
  }
  func.func @transform_3(%arg0: i32, %arg1: i32) -> (i32, i32) {
    %c0_i32 = arith.constant 0 : i32
    %c0_i32_0 = arith.constant 0 : i32
    return %arg0, %c0_i32 : i32, i32
  }
}

</mosaic_0001>

<bundles_post_ra>
// kernel: gcn_forward_padded.4
= control target key start
LH: loop header
LB: loop body
LE: loop exit
PB: predicated region body
PF: predicated region fallthrough
CT: control target
= control target key end

     0   :  { %s1155_s12 = smov 0   ;;  %s1157_s13 = smov 0   ;;  %s1289_s0 = inlined_call_operand.vmem [shape: bf16[256,256], index: 0, kind: input, shape index: {}]   ;;  %s1290_s1 = inlined_call_operand.vmem [shape: bf16[256,128], index: 1, kind: input, shape index: {}]   ;;  %s1291_s2 = inlined_call_operand.vmem [shape: f32[1,128], index: 2, kind: input, shape index: {}]   ;;  %s1292_s3 = inlined_call_operand.vmem [shape: bf16[256,128], index: 3, kind: output, shape index: {}]  }
   0x1   :  { %s1159_s14 = smov 0  }
   0x2 LB: > { %s25_s15 = sadd.s32 1, %s1129_s13  ;;  %p846_p0 = scmp.ge.s32.totalorder %s1133_s14, 1  ;;  %s1133_s14 = sphi %s1159_s14, %s13_s14   ;;  %s1129_s13 = sphi %s1157_s13, %s1294_s13   ;;  %s1125_s12 = sphi %s1155_s12, %s1293_s12  }
   0x3   : > { %p27_p1 = scmp.ge.s32.totalorder %s25_s15, 2  ;;  %p169_p2 = scmp.lt.s32.totalorder %s1133_s14, 3 }
   0x5   : > { %s1296_s15 = smov (%p27_p1, %s25_s15), 0  ;;  %p170_p3 = pnand %p846_p0, %p169_p2 }
   0x6   : > { %s847_s18 = sshll.u32 (!%p170_p3), %s1125_s12, 4 }
   0x7   : > { %173 = sbr.rel (%p170_p3) target bundleno = 277 (0x115), region = 32  ;;  %p205_p4 = scmp.lt.s32.totalorder (!%p170_p3), %s847_s18, 31 }
   0xc   : > { %v1071_v0 = vld [vmem:[%s1290_s1 + $0x78] sm:$0xff]   ;;  %v1073_v2 = vld [vmem:[%s1290_s1 + $0x70] sm:$0xff]   ;;  %v1075_v4 = vld [vmem:[%s1290_s1 + $0x68] sm:$0xff]   ;;  %s1298_s18 = smov (!%p205_p4, %s847_s18), 31 }
   0xd   : > { %v1072_v1 = vld [vmem:[%s1290_s1 + $0x38] sm:$0xff]   ;;  %967 = vmatprep.subr.bf16.mxu0 %v1071_v0  ;;  %1031 = vmatprep.subr.bf16.mxu1 %v1071_v0  ;;  %v1074_v3 = vld [vmem:[%s1290_s1 + $0x30] sm:$0xff]   ;;  %v1076_v5 = vld [vmem:[%s1290_s1 + $0x28] sm:$0xff]   ;;  %s903_s6 = sshll.u32 %s1298_s18, 3  ;;  %s851_s5 = sshll.u32 %s1298_s18, 2 }
   0xe   : > { %968 = vmatpush3.bf16.msra.mxu0 %v1072_v1  ;;  %1039 = vmatpush3.bf16.msra.mxu1 %v1072_v1  ;;  %v1077_v6 = vld [vmem:[%s1290_s1 + $0x60] sm:$0xff]   ;;  %v1079_v8 = vld [vmem:[%s1290_s1 + $0x58] sm:$0xff]   ;;  %s1206_s11 = scalar_lea.vmem %s1289_s0, %s903_s6  ;;  %v1081_v10 = vld [vmem:[%s1290_s1 + $0x50] sm:$0xff]   ;;  %s1258_s8 = scalar_lea.vmem %s1292_s3, %s851_s5 }
   0xf   : > { %969 = vmatprep.subr.bf16.mxu0 %v1073_v2  ;;  %1032 = vmatprep.subr.bf16.mxu1 %v1073_v2  ;;  %v1078_v7 = vld [vmem:[%s1290_s1 + $0x20] sm:$0xff]   ;;  %v1080_v9 = vld [vmem:[%s1290_s1 + $0x18] sm:$0xff]   ;;  %v1082_v13 = vld [vmem:[%s1290_s1 + $0x10] sm:$0xff]  }
  0x10   : > { %v1089_v11 = vld [vmem:[%s1206_s11 + $0x4] ss:$8 sps:$4 sm:$0xff]   ;;  %v1087_v18 = vld [vmem:[%s1206_s11] ss:$8 sps:$4 sm:$0xff]   ;;  %v1093_v20 = vld [vmem:[%s1206_s11 + $0x14] ss:$8 sps:$4 sm:$0xff]  }
  0x11   : > { %v1092_v12 = vld [vmem:[%s1206_s11 + $0x44] ss:$8 sps:$4 sm:$0xff]   ;;  %520 = vmatprep.mubr.bf16.mxu0 %v1089_v11  ;;  %v1090_v19 = vld [vmem:[%s1206_s11 + $0x40] ss:$8 sps:$4 sm:$0xff]   ;;  %v1095_v21 = vld [vmem:[%s1206_s11 + $0x54] ss:$8 sps:$4 sm:$0xff]  }
  0x12   : > { %970 = vmatpush3.bf16.msra.mxu0 %v1074_v3  ;;  %1040 = vmatpush3.bf16.msra.mxu1 %v1074_v3  ;;  %v1083_v14 = vld [vmem:[%s1290_s1 + $0x48] sm:$0xff]   ;;  %v1085_v16 = vld [vmem:[%s1290_s1 + $0x40] sm:$0xff]   ;;  %v1097_v22 = vld [vmem:[%s1206_s11 + $0x10] ss:$8 sps:$4 sm:$0xff]  }
  0x13   : > { %971 = vmatprep.subr.bf16.mxu0 %v1075_v4  ;;  %1033 = vmatprep.subr.bf16.mxu1 %v1075_v4  ;;  %v1084_v15 = vld [vmem:[%s1290_s1 + $0x8] sm:$0xff]   ;;  %v1086_v17 = vld [vmem:[%s1290_s1] sm:$0xff]   ;;  %v1098_v23 = vld [vmem:[%s1206_s11 + $0x50] ss:$8 sps:$4 sm:$0xff]  }
  0x14   : > { %552 = vmatprep.mubr.bf16.mxu1 %v1092_v12  ;;  %v1099_v24 = vld [vmem:[%s1206_s11 + $0x24] ss:$8 sps:$4 sm:$0xff]   ;;  %v1103_v26 = vld [vmem:[%s1206_s11 + $0x20] ss:$8 sps:$4 sm:$0xff]   ;;  %v1105_v28 = vld [vmem:[%s1206_s11 + $0x34] ss:$8 sps:$4 sm:$0xff]  }
  0x15   : > { %v1101_v25 = vld [vmem:[%s1206_s11 + $0x64] ss:$8 sps:$4 sm:$0xff]   ;;  %v1104_v27 = vld [vmem:[%s1206_s11 + $0x60] ss:$8 sps:$4 sm:$0xff]   ;;  %v1107_v29 = vld [vmem:[%s1206_s11 + $0x74] ss:$8 sps:$4 sm:$0xff]  }
  0x16   : > { %972 = vmatpush3.bf16.msra.mxu0 %v1076_v5  ;;  %1041 = vmatpush3.bf16.msra.mxu1 %v1076_v5  ;;  %v1109_v30 = vld [vmem:[%s1206_s11 + $0x30] ss:$8 sps:$4 sm:$0xff]   ;;  %v1248_v37 = vld [vmem:[%s1291_s2] ss:$0 sm:$0xff] }
  0x17   : > { %973 = vmatprep.subr.bf16.mxu0 %v1077_v6  ;;  %1034 = vmatprep.subr.bf16.mxu1 %v1077_v6  ;;  %v1110_v31 = vld [vmem:[%s1206_s11 + $0x70] ss:$8 sps:$4 sm:$0xff]  }
  0x1a   : > { %974 = vmatpush3.bf16.msra.mxu0 %v1078_v7  ;;  %1042 = vmatpush3.bf16.msra.mxu1 %v1078_v7 }
  0x1b   : > { %975 = vmatprep.subr.bf16.mxu0 %v1079_v8  ;;  %1035 = vmatprep.subr.bf16.mxu1 %v1079_v8 }
  0x1e   : > { %976 = vmatpush3.bf16.msra.mxu0 %v1080_v9  ;;  %1043 = vmatpush3.bf16.msra.mxu1 %v1080_v9 }
  0x1f   : > { %977 = vmatprep.subr.bf16.mxu0 %v1081_v10  ;;  %1036 = vmatprep.subr.bf16.mxu1 %v1081_v10 }
  0x22   : > { %978 = vmatpush3.bf16.msra.mxu0 %v1082_v13  ;;  %1044 = vmatpush3.bf16.msra.mxu1 %v1082_v13 }
  0x23   : > { %979 = vmatprep.subr.bf16.mxu0 %v1083_v14  ;;  %1037 = vmatprep.subr.bf16.mxu1 %v1083_v14 }
  0x26   : > { %980 = vmatpush3.bf16.msra.mxu0 %v1084_v15  ;;  %1045 = vmatpush3.bf16.msra.mxu1 %v1084_v15 }
  0x27   : > { %981 = vmatprep.subr.bf16.mxu0 %v1085_v16  ;;  %1038 = vmatprep.subr.bf16.mxu1 %v1085_v16 }
  0x2a   : > { %982 = vmatpush3.bf16.msra.mxu0 %v1086_v17  ;;  %1046 = vmatpush3.bf16.msra.mxu1 %v1086_v17 }
  0x2d   : > { %521 = vmatmul.mubr.bf16.vlgmr.msra.gmra.mxu0 %v1087_v18  ;;  %553 = vmatmul.mubr.bf16.vlgmr.msra.gmra.mxu1 %v1090_v19 }
  0x2e   : > { %528 = vmatprep.mubr.bf16.mxu0 %v1093_v20  ;;  %560 = vmatprep.mubr.bf16.mxu1 %v1095_v21 }
  0x35   : > { %529 = vmatmul.mubr.bf16.gmra.mxu0 %v1097_v22  ;;  %561 = vmatmul.mubr.bf16.gmra.mxu1 %v1098_v23 }
  0x36   : > { %536 = vmatprep.mubr.bf16.mxu0 %v1099_v24  ;;  %568 = vmatprep.mubr.bf16.mxu1 %v1101_v25 }
  0x3d   : > { %537 = vmatmul.mubr.bf16.gmra.mxu0 %v1103_v26  ;;  %569 = vmatmul.mubr.bf16.gmra.mxu1 %v1104_v27 }
  0x3e   : > { %544 = vmatprep.mubr.bf16.mxu0 %v1105_v28  ;;  %576 = vmatprep.mubr.bf16.mxu1 %v1107_v29 }
  0x45   : > { %545 = vmatmul.mubr.bf16.gmra.mxu0 %v1109_v30  ;;  %577 = vmatmul.mubr.bf16.gmra.mxu1 %v1110_v31 }
  0xed   : > { %v983_v32 = vpop.f32.mrf.mxu0  ;;  %v1007_v33 = vpop.f32.mrf.mxu1 }
  0xef   : > { %v984_v34 = vpop.f32.mrf.mxu0  ;;  %v1008_v35 = vpop.f32.mrf.mxu1 }
  0xf0   : > { %v985_v36 = vadd.f32 %v984_v34, %v983_v32  ;;  %v1009_v38 = vadd.f32 %v1008_v35, %v1007_v33 }
  0xf1   : > { %v986_v39 = vpop.f32.mrf.mxu0  ;;  %v1010_v40 = vpop.f32.mrf.mxu1 }
  0xf2   : > { %v643_v41 = vadd.f32 %v985_v36, %v1248_v37  ;;  %v651_v42 = vadd.f32 %v1009_v38, %v1248_v37 }
  0xf3   : > { %v987_v43 = vpop.f32.mrf.mxu0  ;;  %v1011_v44 = vpop.f32.mrf.mxu1 }
  0xf4   : > { %v988_v45 = vadd.f32 %v987_v43, %v986_v39  ;;  %v1012_v46 = vadd.f32 %v1011_v44, %v1010_v40  ;;  %v659_v51 = vmax.f32 %v643_v41, 0.0  ;;  %v667_v52 = vmax.f32 %v651_v42, 0.0 }
  0xf5   : > { %v989_v47 = vpop.f32.mrf.mxu0  ;;  %v1013_v48 = vpop.f32.mrf.mxu1 }
  0xf6   : > { %v644_v49 = vadd.f32 %v988_v45, %v1248_v37  ;;  %v652_v50 = vadd.f32 %v1012_v46, %v1248_v37 }
  0xf7   : > { %v990_v53 = vpop.f32.mrf.mxu0  ;;  %v1014_v54 = vpop.f32.mrf.mxu1 }
  0xf8   : > { %v660_v55 = vmax.f32 %v644_v49, 0.0  ;;  %v668_v56 = vmax.f32 %v652_v50, 0.0  ;;  %v991_v57 = vadd.f32 %v990_v53, %v989_v47  ;;  %v1015_v58 = vadd.f32 %v1014_v54, %v1013_v48 }
  0xf9   : > { %v992_v59 = vpop.f32.mrf.mxu0  ;;  %v1016_v60 = vpop.f32.mrf.mxu1 }
  0xfa   : > { %v923_v61 = vpack.c.bf16 %v660_v55, %v659_v51  ;;  %v943_v62 = vpack.c.bf16 %v668_v56, %v667_v52  ;;  %v645_v63 = vadd.f32 %v991_v57, %v1248_v37  ;;  %v653_v0 = vadd.f32 %v1015_v58, %v1248_v37 }
  0xfb   : > { %v993_v1 = vpop.f32.mrf.mxu0  ;;  %v1017_v2 = vpop.f32.mrf.mxu1 }
  0xfc   : > { %924 = vst [vmem:[%s1258_s8] sm:$0xff] %v923_v61   ;;  %963 = vst [vmem:[%s1258_s8 + $0x20] sm:$0xff] %v943_v62   ;;  %v994_v3 = vadd.f32 %v993_v1, %v992_v59  ;;  %v1018_v4 = vadd.f32 %v1017_v2, %v1016_v60  ;;  %v661_v9 = vmax.f32 %v645_v63, 0.0  ;;  %v669_v10 = vmax.f32 %v653_v0, 0.0 }
  0xfd   : > { %v995_v5 = vpop.f32.mrf.mxu0  ;;  %v1019_v6 = vpop.f32.mrf.mxu1 }
  0xfe   : > { %v646_v7 = vadd.f32 %v994_v3, %v1248_v37  ;;  %v654_v8 = vadd.f32 %v1018_v4, %v1248_v37 }
  0xff   : > { %v996_v11 = vpop.f32.mrf.mxu0  ;;  %v1020_v12 = vpop.f32.mrf.mxu1 }
 0x100   : > { %v662_v13 = vmax.f32 %v646_v7, 0.0  ;;  %v670_v14 = vmax.f32 %v654_v8, 0.0  ;;  %v997_v15 = vadd.f32 %v996_v11, %v995_v5  ;;  %v1021_v16 = vadd.f32 %v1020_v12, %v1019_v6 }
 0x101   : > { %v998_v17 = vpop.f32.mrf.mxu0  ;;  %v1022_v18 = vpop.f32.mrf.mxu1 }
 0x102   : > { %v928_v19 = vpack.c.bf16 %v662_v13, %v661_v9  ;;  %v948_v20 = vpack.c.bf16 %v670_v14, %v669_v10  ;;  %v647_v21 = vadd.f32 %v997_v15, %v1248_v37  ;;  %v655_v22 = vadd.f32 %v1021_v16, %v1248_v37 }
 0x103   : > { %v999_v23 = vpop.f32.mrf.mxu0  ;;  %v1023_v24 = vpop.f32.mrf.mxu1 }
 0x104   : > { %960 = vst [vmem:[%s1258_s8 + $0x8] sm:$0xff] %v928_v19   ;;  %964 = vst [vmem:[%s1258_s8 + $0x28] sm:$0xff] %v948_v20   ;;  %v1000_v25 = vadd.f32 %v999_v23, %v998_v17  ;;  %v1024_v26 = vadd.f32 %v1023_v24, %v1022_v18  ;;  %v663_v31 = vmax.f32 %v647_v21, 0.0  ;;  %v671_v32 = vmax.f32 %v655_v22, 0.0 }
 0x105   : > { %v1001_v27 = vpop.f32.mrf.mxu0  ;;  %v1025_v28 = vpop.f32.mrf.mxu1 }
 0x106   : > { %v648_v29 = vadd.f32 %v1000_v25, %v1248_v37  ;;  %v656_v30 = vadd.f32 %v1024_v26, %v1248_v37 }
 0x107   : > { %v1002_v33 = vpop.f32.mrf.mxu0  ;;  %v1026_v34 = vpop.f32.mrf.mxu1 }
 0x108   : > { %v664_v35 = vmax.f32 %v648_v29, 0.0  ;;  %v672_v36 = vmax.f32 %v656_v30, 0.0  ;;  %v1003_v38 = vadd.f32 %v1002_v33, %v1001_v27  ;;  %v1027_v39 = vadd.f32 %v1026_v34, %v1025_v28 }
 0x109   : > { %v1004_v40 = vpop.f32.mrf.mxu0  ;;  %v1028_v41 = vpop.f32.mrf.mxu1 }
 0x10a   : > { %v933_v42 = vpack.c.bf16 %v664_v35, %v663_v31  ;;  %v953_v43 = vpack.c.bf16 %v672_v36, %v671_v32  ;;  %v649_v46 = vadd.f32 %v1003_v38, %v1248_v37  ;;  %v657_v47 = vadd.f32 %v1027_v39, %v1248_v37 }
 0x10b   : > { %v1005_v44 = vpop.f32.mrf.mxu0  ;;  %v1029_v45 = vpop.f32.mrf.mxu1 }
 0x10c   : > { %961 = vst [vmem:[%s1258_s8 + $0x10] sm:$0xff] %v933_v42   ;;  %965 = vst [vmem:[%s1258_s8 + $0x30] sm:$0xff] %v953_v43   ;;  %v1006_v48 = vadd.f32 %v1005_v44, %v1004_v40  ;;  %v1030_v49 = vadd.f32 %v1029_v45, %v1028_v41  ;;  %v665_v52 = vmax.f32 %v649_v46, 0.0  ;;  %v673_v53 = vmax.f32 %v657_v47, 0.0 }
 0x10e   : > { %v650_v50 = vadd.f32 %v1006_v48, %v1248_v37  ;;  %v658_v51 = vadd.f32 %v1030_v49, %v1248_v37 }
 0x110   : > { %v666_v54 = vmax.f32 %v650_v50, 0.0  ;;  %v674_v55 = vmax.f32 %v658_v51, 0.0 }
 0x112   : > { %v938_v56 = vpack.c.bf16 %v666_v54, %v665_v52  ;;  %v958_v57 = vpack.c.bf16 %v674_v55, %v673_v53 }
 0x114   : > { %962 = vst [vmem:[%s1258_s8 + $0x18] sm:$0xff] %v938_v56   ;;  %966 = vst [vmem:[%s1258_s8 + $0x38] sm:$0xff] %v958_v57  }
 0x115 PF: > { %s13_s14 = sadd.s32 1, %s1133_s14   ;;  %s1293_s12 = smov %s1129_s13 }
 0x116   : > { %p10_p5 = scmp.ge.s32.totalorder %s13_s14, 4   ;;  %s1294_s13 = smov %s1296_s15 }
 0x118   :  { %12 = sbr.rel (!%p10_p5) target bundleno = 2 (0x2), region = 73 }

// kernel: gcn_forward_padded.3
= control target key start
LH: loop header
LB: loop body
LE: loop exit
PB: predicated region body
PF: predicated region fallthrough
CT: control target
= control target key end

     0   :  { %7 = vsyncpa [#allocation4], 0  ;;  %s1212_s0 = inlined_call_operand.hbm [shape: bf16[256,128], index: 0, kind: input, shape index: {}]   ;;  %s1213_s1 = inlined_call_operand.hbm [shape: bf16[128,128], index: 1, kind: input, shape index: {}]   ;;  %s1214_s2 = inlined_call_operand.vmem [shape: bf16[256,128], index: 2, kind: output, shape index: {}]  }
   0x1   :  { %9 = vsyncpa [#allocation4 + $0x1], 0 }
   0x2   :  { %10 = vsyncpa [#allocation6], 0  ;;  %s1076_s9 = smov 0   ;;  %s1078_s10 = smov 0  }
   0x3   :  { %s1080_s11 = smov 0   ;;  %s1082_s12 = smov 0  }
   0x4   :  { %s1084_s13 = smov 0   ;;  %s1086_s14 = smov 0  }
   0x5 LB: > { %s688_s15 = sadd.s32 4294967295, %s1055_s14   ;;  %p50_p0 = scmp.ne.s32.totalorder %s1039_s10, %s1035_s9  ;;  %s1055_s14 = sphi %s1086_s14, %s16_s14   ;;  %s1051_s13 = sphi %s1084_s13, %s1224_s13   ;;  %s1047_s12 = sphi %s1082_s12, %s1223_s12   ;;  %s1043_s11 = sphi %s1080_s11, %s1222_s11   ;;  %s1039_s10 = sphi %s1078_s10, %s1221_s10   ;;  %s1035_s9 = sphi %s1076_s9, %s1220_s9  }
   0x6   : > { %p1106_p1 = scmp.eq.s32.totalorder %s688_s15, 0  ;;  %p690_p2 = scmp.ge.s32.totalorder %s1055_s14, 1 }
   0x7   : > { %p113_p3 = scmp.lt.s32.totalorder %s1055_s14, 3  ;;  %s1057_s19 = smov [#allocation5]  }
   0x8   : > { %p1114_p4 = por %p1106_p1, %p50_p0  ;;  %s128_s20 = sshll.u32 %s1057_s19, 4  ;;  %s129_s20 = int_to_ptr.vmem [resolvable:$true] %s128_s20 }
   0x9   : > { %p1118_p5 = pnand %p690_p2, %p113_p3  ;;  %s28_s22 = sadd.s32 1, %s1051_s13 }
   0xa   : > { %s958_s23 = scalar_lea.vmem %s129_s20, 1024  ;;  %p966_p12 = scmp.lt.s32.totalorder %s129_s20, %s129_s20 }
   0xb   : > { %p869_p6 = pneg %p1118_p5  ;;  %p959_p9 = scmp.ne.s32.totalorder %s129_s20, %s958_s23 }
   0xc   : > { %p967_p13 = scmp.lt.s32.totalorder %s958_s23, %s958_s23 }
   0xd   : > { %p1126_p7 = pnand %p869_p6, %p1106_p1 }
   0xe   : > { %p968_p0 = por %p967_p13, %p966_p12 }
   0xf   : > { %p949_p8 = pneg %p1126_p7 }
  0x11   : > { %p961_p10 = pnand %p959_p9, %p949_p8 }
  0x13   : > { %p962_p11 = pneg %p961_p10 }
  0x15   : > { %p969_p2 = pnand %p968_p0, %p962_p11 }
  0x17   : > { %972 = shalt.err (!%p969_p2)
}
  0x18   : > { %s1058_s24 = smov 64   ;;  %s1059_s25 = smov 4  }
  0x19   : > { %872 = dma.hbm_to_vmem [thread:$0]  (!%p1126_p7), %s1213_s1, 1024, %s129_s20, [#allocation6], %s1058_s24, %s1058_s24, %s1059_s25  }
  0x1a   : > { %p30_p3 = scmp.ge.s32.totalorder %s28_s22, 2  ;;  %s37_s28 = sadd.s32 1, %s1043_s11 }
  0x1b   : > { %p44_p6 = scmp.ne.s32.totalorder %s1043_s11, %s1039_s10  ;;  %p45_p8 = scmp.eq.s32.totalorder %s1055_s14, 0 }
  0x1c   : > { %s1226_s22 = smov (%p30_p3, %s28_s22), 0  ;;  %p878_p10 = scmp.lt.s32.totalorder %s1055_s14, 2 }
  0x1d   : > { %p46_p9 = por %p45_p8, %p44_p6  ;;  %s32_s29 = ssub.s32 %s1051_s13, %s1226_s22 }
  0x1e   : > { %s142_s30 = sand.u32 1, %s1043_s11   ;;  %p35_p11 = scmp.eq.s32.totalorder %s32_s29, 0 }
  0x1f   : > { %s693_s3 = sshll.u32 %s142_s30, 6  ;;  %s735_s4 = sshll.u32 %s1051_s13, 10 }
  0x20   : > { %s1153_s5 = scalar_select %p35_p11, %s1043_s11, %s37_s28  }
  0x21   : > { %s153_s8 = scalar_lea.hbm %s1212_s0, %s735_s4  ;;  %s146_s9 = scalar_lea.vmem [#allocation3], %s693_s3 }
  0x22   : > { %s154_s15 = sshll.u32 %s146_s9, 4  ;;  %p1158_p7 = pnand %p878_p10, %p46_p9  ;;  %s155_s15 = int_to_ptr.vmem [resolvable:$true] %s154_s15 }
  0x23   : > { %s143_s20 = scalar_lea.sflag [#allocation4], %s142_s30  ;;  %s986_s21 = scalar_lea.vmem %s155_s15, 1024 }
  0x24   : > { %p975_p12 = pneg %p1158_p7  ;;  %p987_p13 = scmp.ne.s32.totalorder %s155_s15, %s986_s21 }
  0x25   : > { %s1060_s23 = smov [#allocation3]  }
  0x26   : > { %p989_p0 = pnand %p987_p13, %p975_p12  ;;  %s991_s26 = sshll.u32 %s1060_s23, 4  ;;  %s992_s26 = int_to_ptr.vmem [resolvable:$false] %s991_s26 }
  0x27   : > { %s993_s27 = scalar_lea.vmem %s992_s26, 2048  ;;  %p994_p3 = scmp.lt.s32.totalorder %s155_s15, %s992_s26 }
  0x28   : > { %p990_p2 = pneg %p989_p0  ;;  %p995_p6 = scmp.lt.s32.totalorder %s993_s27, %s986_s21 }
  0x2a   : > { %p996_p8 = por %p995_p6, %p994_p3 }
  0x2c   : > { %p997_p9 = pnand %p996_p8, %p990_p2 }
  0x2e   : > { %1000 = shalt.err (!%p997_p9)
}
  0x2f   : > { %876 = dma.hbm_to_vmem [thread:$0]  (!%p1158_p7), %s153_s8, 1024, %s155_s15, %s143_s20, %s1058_s24, %s1058_s24, %s1059_s25  }
  0x30   : > { %166 = sbr.rel (%p1118_p5) target bundleno = 299 (0x12b), region = 28  ;;  %s168_s28 = sand.u32 (!%p1118_p5), 1, %s1039_s10  }
  0x31   : > { %s697_s29 = sshll.u32 (!%p1118_p5), %s168_s28, 6  ;;  %s169_s30 = scalar_lea.sflag (!%p1118_p5), [#allocation4], %s168_s28 }
  0x32   : > { %s1172_s3 = scalar_lea.vmem (!%p1118_p5), [#allocation3], %s697_s29 }
  0x35   : > { %1026 = dma.done.wait (%p1114_p4), %s169_s30, 1024  }
  0x36   : > { %1028 = vsyncadd (%p1114_p4), %s169_s30, 4294966272 }
  0x37   : > { %1030 = dma.done.wait (%p1106_p1), [#allocation6], 1024  }
  0x38   : > { %1032 = vsyncadd (%p1106_p1), [#allocation6], 4294966272  ;;  %v931_v0 = vld [vmem:[#allocation5 + $0x38] sm:$0xff]   ;;  %v932_v1 = vld [vmem:[#allocation5 + $0x30] sm:$0xff]   ;;  %s699_s16 = sshll.u32 %s1047_s12, 4 }
  0x39   : > { %815 = vmatprep.subr.bf16.mxu0 %v931_v0  ;;  %847 = vmatprep.subr.bf16.mxu1 %v931_v0  ;;  %v933_v2 = vld [vmem:[#allocation5 + $0x28] sm:$0xff]   ;;  %v934_v3 = vld [vmem:[#allocation5 + $0x20] sm:$0xff]   ;;  %v935_v6 = vld [vmem:[#allocation5 + $0x18] sm:$0xff]   ;;  %p200_p1 = scmp.lt.s32.totalorder %s699_s16, 31 }
  0x3a   : > { %816 = vmatpush3.bf16.msra.mxu0 %v931_v0  ;;  %855 = vmatpush3.bf16.msra.mxu1 %v931_v0  ;;  %v939_v4 = vld [vmem:[%s1172_s3] sm:$0xff]   ;;  %v936_v7 = vld [vmem:[#allocation5 + $0x10] sm:$0xff]   ;;  %v937_v8 = vld [vmem:[#allocation5 + $0x8] sm:$0xff]  }
  0x3b   : > { %817 = vmatprep.subr.bf16.mxu0 %v932_v1  ;;  %848 = vmatprep.subr.bf16.mxu1 %v932_v1  ;;  %v940_v5 = vld [vmem:[%s1172_s3 + $0x20] sm:$0xff]   ;;  %v941_v10 = vld [vmem:[%s1172_s3 + $0x8] sm:$0xff]   ;;  %v943_v12 = vld [vmem:[%s1172_s3 + $0x10] sm:$0xff]   ;;  %s1228_s16 = smov (!%p200_p1, %s699_s16), 31 }
  0x3c   : > { %831 = vmatprep.mubr.bf16.mxu0 %v939_v4  ;;  %839 = vmatprep.mubr.bf16.mxu1 %v940_v5  ;;  %v938_v9 = vld [vmem:[#allocation5] sm:$0xff]   ;;  %v942_v11 = vld [vmem:[%s1172_s3 + $0x28] sm:$0xff]   ;;  %v944_v13 = vld [vmem:[%s1172_s3 + $0x30] sm:$0xff]   ;;  %s700_s17 = sshll.u32 %s1228_s16, 2 }
  0x3d   : > { %v945_v14 = vld [vmem:[%s1172_s3 + $0x18] sm:$0xff]   ;;  %s203_s25 = scalar_lea.vmem %s1214_s2, %s700_s17 }
  0x3e   : > { %818 = vmatpush3.bf16.msra.mxu0 %v932_v1  ;;  %856 = vmatpush3.bf16.msra.mxu1 %v932_v1  ;;  %v946_v15 = vld [vmem:[%s1172_s3 + $0x38] sm:$0xff]  }
  0x3f   : > { %819 = vmatprep.subr.bf16.mxu0 %v933_v2  ;;  %849 = vmatprep.subr.bf16.mxu1 %v933_v2 }
  0x42   : > { %820 = vmatpush3.bf16.msra.mxu0 %v933_v2  ;;  %857 = vmatpush3.bf16.msra.mxu1 %v933_v2 }
  0x43   : > { %821 = vmatprep.subr.bf16.mxu0 %v934_v3  ;;  %850 = vmatprep.subr.bf16.mxu1 %v934_v3 }
  0x46   : > { %822 = vmatpush3.bf16.msra.mxu0 %v934_v3  ;;  %858 = vmatpush3.bf16.msra.mxu1 %v934_v3 }
  0x47   : > { %823 = vmatprep.subr.bf16.mxu0 %v935_v6  ;;  %851 = vmatprep.subr.bf16.mxu1 %v935_v6 }
  0x4a   : > { %824 = vmatpush3.bf16.msra.mxu0 %v935_v6  ;;  %859 = vmatpush3.bf16.msra.mxu1 %v935_v6 }
  0x4b   : > { %825 = vmatprep.subr.bf16.mxu0 %v936_v7  ;;  %852 = vmatprep.subr.bf16.mxu1 %v936_v7 }
  0x4e   : > { %826 = vmatpush3.bf16.msra.mxu0 %v936_v7  ;;  %860 = vmatpush3.bf16.msra.mxu1 %v936_v7 }
  0x4f   : > { %827 = vmatprep.subr.bf16.mxu0 %v937_v8  ;;  %853 = vmatprep.subr.bf16.mxu1 %v937_v8 }
  0x52   : > { %828 = vmatpush3.bf16.msra.mxu0 %v937_v8  ;;  %861 = vmatpush3.bf16.msra.mxu1 %v937_v8 }
  0x53   : > { %829 = vmatprep.subr.bf16.mxu0 %v938_v9  ;;  %854 = vmatprep.subr.bf16.mxu1 %v938_v9 }
  0x56   : > { %830 = vmatpush3.bf16.msra.mxu0 %v938_v9  ;;  %862 = vmatpush3.bf16.msra.mxu1 %v938_v9 }
  0x59   : > { %832 = vmatmul.mubr.bf16.vlgmr.msra.gmra.mxu0 %v941_v10  ;;  %840 = vmatmul.mubr.bf16.vlgmr.msra.gmra.mxu1 %v942_v11 }
  0x5a   : > { %835 = vmatprep.mubr.bf16.mxu0 %v943_v12  ;;  %843 = vmatprep.mubr.bf16.mxu1 %v944_v13 }
  0x61   : > { %836 = vmatmul.mubr.bf16.gmra.mxu0 %v945_v14  ;;  %844 = vmatmul.mubr.bf16.gmra.mxu1 %v946_v15 }
 0x119   : > { %v833_v16 = vpop.f32.mrf.mxu0  ;;  %v841_v17 = vpop.f32.mrf.mxu1 }
 0x11b   : > { %v404_v18 = vpop.f32.mrf.mxu0  ;;  %v436_v19 = vpop.f32.mrf.mxu1 }
 0x11d   : > { %v834_v20 = vpop.f32.mrf.mxu0  ;;  %v842_v21 = vpop.f32.mrf.mxu1 }
 0x11e   : > { %v760_v22 = vpack.c.bf16 %v834_v20, %v833_v16  ;;  %v780_v23 = vpack.c.bf16 %v842_v21, %v841_v17 }
 0x11f   : > { %v407_v24 = vpop.f32.mrf.mxu0  ;;  %v439_v25 = vpop.f32.mrf.mxu1 }
 0x120   : > { %792 = vst [vmem:[%s203_s25 + $0x8] sm:$0xff] %v760_v22   ;;  %796 = vst [vmem:[%s203_s25 + $0x28] sm:$0xff] %v780_v23   ;;  %v755_v26 = vpack.c.bf16 %v407_v24, %v404_v18  ;;  %v775_v27 = vpack.c.bf16 %v439_v25, %v436_v19 }
 0x121   : > { %v837_v28 = vpop.f32.mrf.mxu0  ;;  %v845_v29 = vpop.f32.mrf.mxu1 }
 0x122   : > { %756 = vst [vmem:[%s203_s25] sm:$0xff] %v755_v26   ;;  %795 = vst [vmem:[%s203_s25 + $0x20] sm:$0xff] %v775_v27  }
 0x123   : > { %v420_v30 = vpop.f32.mrf.mxu0  ;;  %v452_v31 = vpop.f32.mrf.mxu1 }
 0x125   : > { %v838_v32 = vpop.f32.mrf.mxu0  ;;  %v846_v33 = vpop.f32.mrf.mxu1 }
 0x126   : > { %v770_v34 = vpack.c.bf16 %v838_v32, %v837_v28  ;;  %v790_v35 = vpack.c.bf16 %v846_v33, %v845_v29 }
 0x127   : > { %v423_v36 = vpop.f32.mrf.mxu0  ;;  %v455_v37 = vpop.f32.mrf.mxu1 }
 0x128   : > { %794 = vst [vmem:[%s203_s25 + $0x18] sm:$0xff] %v770_v34   ;;  %798 = vst [vmem:[%s203_s25 + $0x38] sm:$0xff] %v790_v35   ;;  %v765_v38 = vpack.c.bf16 %v423_v36, %v420_v30  ;;  %v785_v39 = vpack.c.bf16 %v455_v37, %v452_v31 }
 0x12a   : > { %793 = vst [vmem:[%s203_s25 + $0x10] sm:$0xff] %v765_v38   ;;  %797 = vst [vmem:[%s203_s25 + $0x30] sm:$0xff] %v785_v39  }
 0x12b PF: > { %s16_s14 = sadd.s32 1, %s1055_s14   ;;  %s1220_s9 = smov %s1039_s10 }
 0x12c   : > { %p13_p4 = scmp.ge.s32.totalorder %s16_s14, 4   ;;  %s1221_s10 = smov %s1043_s11 }
 0x12d   : > { %s1222_s11 = smov %s1153_s5  ;;  %s1223_s12 = smov %s1051_s13 }
 0x12e   : > { %s1224_s13 = smov %s1226_s22  ;;  %15 = sbr.rel (!%p13_p4) target bundleno = 5 (0x5), region = 81 }
 0x133   :  { %620 = vsyncpa [#allocation4], 1 }
 0x134   :  { %622 = vsyncpa [#allocation4 + $0x1], 1 }
 0x135   :  { %623 = vsyncpa [#allocation6], 1 }

// kernel: gcn_forward_padded.5
= control target key start
LH: loop header
LB: loop body
LE: loop exit
PB: predicated region body
PF: predicated region fallthrough
CT: control target
= control target key end

     0   :  { %s1616_s15 = smov 0   ;;  %s1618_s16 = smov 0   ;;  %s2018_s0 = inlined_call_operand.vmem [shape: bf16[256,256], index: 0, kind: input, shape index: {}]   ;;  %s2019_s1 = inlined_call_operand.vmem [shape: bf16[256,128], index: 1, kind: input, shape index: {}]   ;;  %s2020_s2 = inlined_call_operand.vmem [shape: bf16[128,128], index: 2, kind: input, shape index: {}]   ;;  %s2021_s3 = inlined_call_operand.vmem [shape: f32[1,128], index: 3, kind: input, shape index: {}]   ;;  %s2022_s4 = inlined_call_operand.vmem [shape: f32[256,128], index: 4, kind: output, shape index: {}]  }
   0x1   :  { %s1620_s17 = smov 0  }
   0x2 LB: > { %s26_s18 = sadd.s32 1, %s1585_s16  ;;  %p1245_p0 = scmp.ge.s32.totalorder %s1589_s17, 1  ;;  %s1589_s17 = sphi %s1620_s17, %s14_s17   ;;  %s1585_s16 = sphi %s1618_s16, %s2024_s16   ;;  %s1581_s15 = sphi %s1616_s15, %s2023_s15  }
   0x3   : > { %p28_p1 = scmp.ge.s32.totalorder %s26_s18, 2  ;;  %p194_p2 = scmp.lt.s32.totalorder %s1589_s17, 3 }
   0x5   : > { %s2026_s18 = smov (%p28_p1, %s26_s18), 0  ;;  %p195_p3 = pnand %p1245_p0, %p194_p2 }
   0x6   : > { %s1246_s23 = sshll.u32 (!%p195_p3), %s1581_s15, 4 }
   0x7   : > { %198 = sbr.rel (%p195_p3) target bundleno = 907 (0x38b), region = 36  ;;  %p232_p4 = scmp.lt.s32.totalorder (!%p195_p3), %s1246_s23, 31 }
   0xc   : > { %v1455_v0 = vld [vmem:[%s2020_s2 + $0x38] sm:$0xff]   ;;  %v1456_v1 = vld [vmem:[%s2020_s2 + $0x30] sm:$0xff]   ;;  %v1457_v2 = vld [vmem:[%s2020_s2 + $0x28] sm:$0xff]   ;;  %s2028_s23 = smov (!%p232_p4, %s1246_s23), 31 }
   0xd   : > { %1383 = vmatprep.subr.bf16.mxu0 %v1455_v0  ;;  %v1458_v3 = vld [vmem:[%s2020_s2 + $0x20] sm:$0xff]   ;;  %v1459_v5 = vld [vmem:[%s2020_s2 + $0x18] sm:$0xff]   ;;  %v1460_v6 = vld [vmem:[%s2020_s2 + $0x10] sm:$0xff]   ;;  %s1294_s24 = sshll.u32 %s2028_s23, 3 }
   0xe   : > { %1384 = vmatpush3.bf16.msra.mxu0 %v1455_v0  ;;  %v1463_v4 = vld [vmem:[%s2019_s1] sm:$0xff]   ;;  %v1461_v7 = vld [vmem:[%s2020_s2 + $0x8] sm:$0xff]   ;;  %v1465_v10 = vld [vmem:[%s2019_s1 + $0x10] sm:$0xff]   ;;  %s1717_s27 = scalar_lea.vmem %s2018_s0, %s1294_s24  ;;  %s1943_s5 = scalar_lea.vmem %s2022_s4, %s1294_s24 }
   0xf   : > { %1385 = vmatprep.subr.bf16.mxu0 %v1456_v1  ;;  %1399 = vmatprep.mubr.bf16.mxu0 %v1463_v4  ;;  %v1462_v8 = vld [vmem:[%s2020_s2] sm:$0xff]   ;;  %v1464_v9 = vld [vmem:[%s2019_s1 + $0x8] sm:$0xff]   ;;  %v1466_v11 = vld [vmem:[%s2019_s1 + $0x18] sm:$0xff]  }
  0x10   : > { %v1467_v12 = vld [vmem:[%s2019_s1 + $0x20] sm:$0xff]   ;;  %v1468_v13 = vld [vmem:[%s2019_s1 + $0x28] sm:$0xff]   ;;  %v1469_v14 = vld [vmem:[%s2019_s1 + $0x30] sm:$0xff]  }
  0x11   : > { %v1470_v15 = vld [vmem:[%s2019_s1 + $0x38] sm:$0xff]   ;;  %v1471_v16 = vld [vmem:[%s2019_s1 + $0x40] sm:$0xff]   ;;  %v1472_v17 = vld [vmem:[%s2019_s1 + $0x48] sm:$0xff]  }
  0x12   : > { %1386 = vmatpush3.bf16.msra.mxu0 %v1456_v1  ;;  %v1473_v18 = vld [vmem:[%s2019_s1 + $0x50] sm:$0xff]   ;;  %v1474_v19 = vld [vmem:[%s2019_s1 + $0x58] sm:$0xff]   ;;  %v1475_v20 = vld [vmem:[%s2019_s1 + $0x60] sm:$0xff]  }
  0x13   : > { %1387 = vmatprep.subr.bf16.mxu0 %v1457_v2  ;;  %v1476_v21 = vld [vmem:[%s2019_s1 + $0x68] sm:$0xff]   ;;  %v1477_v22 = vld [vmem:[%s2019_s1 + $0x70] sm:$0xff]   ;;  %v1478_v23 = vld [vmem:[%s2019_s1 + $0x78] sm:$0xff]  }
  0x14   : > { %v1481_v24 = vld [vmem:[%s1717_s27 + $0x4] ss:$8 sps:$4 sm:$0xff]  }
  0x15   : > { %788 = vmatprep.mubr.bf16.mxu1 %v1481_v24  ;;  %v927_v24 = vlaneseq }
  0x16   : > { %1388 = vmatpush3.bf16.msra.mxu0 %v1457_v2 }
  0x17   : > { %1389 = vmatprep.subr.bf16.mxu0 %v1458_v3 }
  0x1a   : > { %1390 = vmatpush3.bf16.msra.mxu0 %v1458_v3 }
  0x1b   : > { %1391 = vmatprep.subr.bf16.mxu0 %v1459_v5 }
  0x1e   : > { %1392 = vmatpush3.bf16.msra.mxu0 %v1459_v5 }
  0x1f   : > { %1393 = vmatprep.subr.bf16.mxu0 %v1460_v6 }
  0x22   : > { %1394 = vmatpush3.bf16.msra.mxu0 %v1460_v6 }
  0x23   : > { %1395 = vmatprep.subr.bf16.mxu0 %v1461_v7 }
  0x26   : > { %1396 = vmatpush3.bf16.msra.mxu0 %v1461_v7 }
  0x27   : > { %1397 = vmatprep.subr.bf16.mxu0 %v1462_v8 }
  0x2a   : > { %1398 = vmatpush3.bf16.msra.mxu0 %v1462_v8 }
  0x2d   : > { %1400 = vmatmul.mubr.bf16.vlgmr.msra.gmra.mxu0 %v1464_v9  ;;  %v1479_v9 = vld [vmem:[%s1717_s27] ss:$8 sps:$4 sm:$0xff]  }
  0x2e   : > { %1403 = vmatprep.mubr.bf16.mxu0 %v1465_v10  ;;  %v1482_v10 = vld [vmem:[%s1717_s27 + $0x14] ss:$8 sps:$4 sm:$0xff]  }
  0x35   : > { %1404 = vmatmul.mubr.bf16.gmra.mxu0 %v1466_v11  ;;  %v1484_v11 = vld [vmem:[%s1717_s27 + $0x10] ss:$8 sps:$4 sm:$0xff]  }
  0x36   : > { %1407 = vmatprep.mubr.bf16.mxu0 %v1467_v12  ;;  %v1485_v12 = vld [vmem:[%s1717_s27 + $0x24] ss:$8 sps:$4 sm:$0xff]  }
  0x3d   : > { %1408 = vmatmul.mubr.bf16.gmra.mxu0 %v1468_v13  ;;  %v1487_v13 = vld [vmem:[%s1717_s27 + $0x20] ss:$8 sps:$4 sm:$0xff]  }
  0x3e   : > { %1411 = vmatprep.mubr.bf16.mxu0 %v1469_v14  ;;  %v1488_v14 = vld [vmem:[%s1717_s27 + $0x34] ss:$8 sps:$4 sm:$0xff]  }
  0x45   : > { %1412 = vmatmul.mubr.bf16.gmra.mxu0 %v1470_v15  ;;  %v1490_v15 = vld [vmem:[%s1717_s27 + $0x30] ss:$8 sps:$4 sm:$0xff]  }
  0x46   : > { %1415 = vmatprep.mubr.bf16.mxu0 %v1471_v16  ;;  %v1491_v16 = vld [vmem:[%s1717_s27 + $0x44] ss:$8 sps:$4 sm:$0xff]  }
  0x4d   : > { %1416 = vmatmul.mubr.bf16.gmra.mxu0 %v1472_v17  ;;  %v1493_v17 = vld [vmem:[%s1717_s27 + $0x40] ss:$8 sps:$4 sm:$0xff]  }
  0x4e   : > { %1419 = vmatprep.mubr.bf16.mxu0 %v1473_v18  ;;  %v1494_v18 = vld [vmem:[%s1717_s27 + $0x54] ss:$8 sps:$4 sm:$0xff]  }
  0x55   : > { %1420 = vmatmul.mubr.bf16.gmra.mxu0 %v1474_v19  ;;  %v1496_v19 = vld [vmem:[%s1717_s27 + $0x50] ss:$8 sps:$4 sm:$0xff]  }
  0x56   : > { %1423 = vmatprep.mubr.bf16.mxu0 %v1475_v20  ;;  %v1497_v20 = vld [vmem:[%s1717_s27 + $0x64] ss:$8 sps:$4 sm:$0xff]  }
  0x5d   : > { %1424 = vmatmul.mubr.bf16.gmra.mxu0 %v1476_v21  ;;  %v1499_v21 = vld [vmem:[%s1717_s27 + $0x60] ss:$8 sps:$4 sm:$0xff]  }
  0x5e   : > { %1427 = vmatprep.mubr.bf16.mxu0 %v1477_v22  ;;  %v1500_v22 = vld [vmem:[%s1717_s27 + $0x74] ss:$8 sps:$4 sm:$0xff]  }
  0x65   : > { %1428 = vmatmul.mubr.bf16.gmra.mxu0 %v1478_v23  ;;  %v1502_v23 = vld [vmem:[%s1717_s27 + $0x70] ss:$8 sps:$4 sm:$0xff]  }
  0xed   : > { %v1401_v25 = vpop.f32.mrf.mxu0 }
  0xef   : > { %v1720_v26 = vpop.f32.mrf.mxu0 }
  0xf1   : > { %v1402_v27 = vpop.f32.mrf.mxu0 }
  0xf2   : > { %v629_v28 = vpack.c.bf16 %v1402_v27, %v1401_v25 }
  0xf3   : > { %v504_v29 = vpop.f32.mrf.mxu0 }
  0xf4   : > { %v628_v30 = vpack.c.bf16 %v504_v29, %v1720_v26  ;;  %v1738_v26 = vand.u32 127, %v927_v24 }
  0xf5   : > { %v1405_v31 = vpop.f32.mrf.mxu0 }
  0xf6   : > { %vm929_vm0 = vcmp.lt.s32.totalorder %v1738_v26, 8 }
  0xf7   : > { %v517_v32 = vpop.f32.mrf.mxu0 }
  0xf9   : > { %v1406_v33 = vpop.f32.mrf.mxu0 }
  0xfa   : > { %v631_v34 = vpack.c.bf16 %v1406_v33, %v1405_v31 }
  0xfb   : > { %v520_v35 = vpop.f32.mrf.mxu0 }
  0xfc   : > { %v630_v36 = vpack.c.bf16 %v520_v35, %v517_v32 }
  0xfd   : > { %v1409_v37 = vpop.f32.mrf.mxu0 }
  0xff   : > { %v533_v38 = vpop.f32.mrf.mxu0 }
 0x101   : > { %v1410_v39 = vpop.f32.mrf.mxu0 }
 0x102   : > { %v633_v2 = vpack.c.bf16 %v1410_v39, %v1409_v37 }
 0x103   : > { %v536_v40 = vpop.f32.mrf.mxu0 }
 0x104   : > { %v632_v4 = vpack.c.bf16 %v536_v40, %v533_v38 }
 0x105   : > { %v1413_v41 = vpop.f32.mrf.mxu0 }
 0x107   : > { %v549_v42 = vpop.f32.mrf.mxu0 }
 0x109   : > { %v1414_v43 = vpop.f32.mrf.mxu0 }
 0x10a   : > { %v635_v61 = vpack.c.bf16 %v1414_v43, %v1413_v41 }
 0x10b   : > { %v552_v44 = vpop.f32.mrf.mxu0 }
 0x10c   : > { %v634_v0 = vpack.c.bf16 %v552_v44, %v549_v42 }
 0x10d   : > { %v1417_v45 = vpop.f32.mrf.mxu0 }
 0x10f   : > { %v565_v46 = vpop.f32.mrf.mxu0 }
 0x111   : > { %v1418_v47 = vpop.f32.mrf.mxu0 }
 0x112   : > { %v637_v7 = vpack.c.bf16 %v1418_v47, %v1417_v45 }
 0x113   : > { %v568_v48 = vpop.f32.mrf.mxu0 }
 0x114   : > { %v636_v8 = vpack.c.bf16 %v568_v48, %v565_v46 }
 0x115   : > { %v1421_v49 = vpop.f32.mrf.mxu0 }
 0x117   : > { %v581_v50 = vpop.f32.mrf.mxu0 }
 0x119   : > { %v1422_v51 = vpop.f32.mrf.mxu0 }
 0x11a   : > { %v639_v5 = vpack.c.bf16 %v1422_v51, %v1421_v49 }
 0x11b   : > { %v584_v52 = vpop.f32.mrf.mxu0 }
 0x11c   : > { %v638_v6 = vpack.c.bf16 %v584_v52, %v581_v50 }
 0x11d   : > { %v1425_v53 = vpop.f32.mrf.mxu0 }
 0x11f   : > { %v597_v54 = vpop.f32.mrf.mxu0 }
 0x121   : > { %v1426_v55 = vpop.f32.mrf.mxu0 }
 0x122   : > { %v641_v1 = vpack.c.bf16 %v1426_v55, %v1425_v53 }
 0x123   : > { %v600_v56 = vpop.f32.mrf.mxu0 }
 0x124   : > { %v640_v3 = vpack.c.bf16 %v600_v56, %v597_v54 }
 0x125   : > { %v1429_v57 = vpop.f32.mrf.mxu0 }
 0x127   : > { %v613_v58 = vpop.f32.mrf.mxu0 }
 0x129   : > { %v1430_v59 = vpop.f32.mrf.mxu0 }
 0x12a   : > { %v643_v60 = vpack.c.bf16 %v1430_v59, %v1429_v57 }
 0x12b   : > { %v616_v62 = vpop.f32.mrf.mxu0 }
 0x12c   : > { %v642_v63 = vpack.c.bf16 %v616_v62, %v613_v58  ;;  %1319 = vmatprep.subr.bf16.mxu1 %v643_v60 }
 0x12d   : > { %1320 = vmatpush3.bf16.msra.mxu1 %v635_v61 }
 0x12e   : > { %1321 = vmatprep.subr.bf16.mxu1 %v642_v63 }
 0x131   : > { %1322 = vmatpush3.bf16.msra.mxu1 %v634_v0 }
 0x132   : > { %1323 = vmatprep.subr.bf16.mxu1 %v641_v1 }
 0x135   : > { %1324 = vmatpush3.bf16.msra.mxu1 %v633_v2 }
 0x136   : > { %1325 = vmatprep.subr.bf16.mxu1 %v640_v3 }
 0x139   : > { %1326 = vmatpush3.bf16.msra.mxu1 %v632_v4 }
 0x13a   : > { %1327 = vmatprep.subr.bf16.mxu1 %v639_v5 }
 0x13d   : > { %1328 = vmatpush3.bf16.msra.mxu1 %v631_v34 }
 0x13e   : > { %1329 = vmatprep.subr.bf16.mxu1 %v638_v6 }
 0x141   : > { %1330 = vmatpush3.bf16.msra.mxu1 %v630_v36 }
 0x142   : > { %1331 = vmatprep.subr.bf16.mxu1 %v637_v7 }
 0x145   : > { %1332 = vmatpush3.bf16.msra.mxu1 %v629_v28  ;;  %v1743_v28 = vld [vmem:[%s2021_s3] ss:$0 sm:$0xff] }
 0x146   : > { %1333 = vmatprep.subr.bf16.mxu1 %v636_v8 }
 0x149   : > { %1334 = vmatpush3.bf16.msra.mxu1 %v628_v30 }
 0x14c   : > { %789 = vmatmul.mubr.bf16.vlgmr.msra.gmra.mxu1 %v1479_v9 }
 0x14d   : > { %796 = vmatprep.mubr.bf16.mxu1 %v1482_v10 }
 0x154   : > { %797 = vmatmul.mubr.bf16.gmra.mxu1 %v1484_v11 }
 0x155   : > { %804 = vmatprep.mubr.bf16.mxu1 %v1485_v12 }
 0x15c   : > { %805 = vmatmul.mubr.bf16.gmra.mxu1 %v1487_v13 }
 0x15d   : > { %812 = vmatprep.mubr.bf16.mxu1 %v1488_v14 }
 0x164   : > { %813 = vmatmul.mubr.bf16.gmra.mxu1 %v1490_v15 }
 0x165   : > { %820 = vmatprep.mubr.bf16.mxu1 %v1491_v16 }
 0x16c   : > { %821 = vmatmul.mubr.bf16.gmra.mxu1 %v1493_v17 }
 0x16d   : > { %828 = vmatprep.mubr.bf16.mxu1 %v1494_v18 }
 0x174   : > { %829 = vmatmul.mubr.bf16.gmra.mxu1 %v1496_v19 }
 0x175   : > { %836 = vmatprep.mubr.bf16.mxu1 %v1497_v20 }
 0x17c   : > { %837 = vmatmul.mubr.bf16.gmra.mxu1 %v1499_v21 }
 0x17d   : > { %844 = vmatprep.mubr.bf16.mxu1 %v1500_v22 }
 0x184   : > { %845 = vmatmul.mubr.bf16.gmra.mxu1 %v1502_v23 }
 0x20c   : > { %v1335_v25 = vpop.f32.mrf.mxu1 }
 0x20e   : > { %v1336_v27 = vpop.f32.mrf.mxu1 }
 0x20f   : > { %v1337_v29 = vadd.f32 %v1336_v27, %v1335_v25 }
 0x210   : > { %v1338_v30 = vpop.f32.mrf.mxu1 }
 0x211   : > { %v1747_v31 = vadd.f32 %v1337_v29, %v1743_v28 }
 0x212   : > { %v1339_v32 = vpop.f32.mrf.mxu1 }
 0x213   : > { %v1340_v33 = vadd.f32 %v1339_v32, %v1338_v30  ;;  %v930_v34 = vsel %vm929_vm0, %v1747_v31, -1e+30 }
 0x214   : > { %v1341_v35 = vpop.f32.mrf.mxu1  ;;  %946 = vmax.xlane.f32.xlu0 %v930_v34 }
 0x215   : > { %v1753_v36 = vadd.f32 %v1340_v33, %v1743_v28 }
 0x216   : > { %v1342_v37 = vpop.f32.mrf.mxu1 }
 0x217   : > { %v1343_v38 = vadd.f32 %v1342_v37, %v1341_v35  ;;  %v931_v39 = vsel %vm929_vm0, %v1753_v36, -1e+30 }
 0x218   : > { %v1344_v40 = vpop.f32.mrf.mxu1  ;;  %948 = vmax.xlane.f32.xlu0 %v931_v39 }
 0x219   : > { %v1759_v41 = vadd.f32 %v1343_v38, %v1743_v28 }
 0x21a   : > { %v1345_v42 = vpop.f32.mrf.mxu1 }
 0x21b   : > { %v1346_v43 = vadd.f32 %v1345_v42, %v1344_v40  ;;  %v932_v44 = vsel %vm929_vm0, %v1759_v41, -1e+30 }
 0x21c   : > { %v1347_v45 = vpop.f32.mrf.mxu1  ;;  %950 = vmax.xlane.f32.xlu1 %v932_v44 }
 0x21d   : > { %v1765_v46 = vadd.f32 %v1346_v43, %v1743_v28 }
 0x21e   : > { %v1348_v47 = vpop.f32.mrf.mxu1 }
 0x21f   : > { %v1349_v48 = vadd.f32 %v1348_v47, %v1347_v45  ;;  %v933_v49 = vsel %vm929_vm0, %v1765_v46, -1e+30 }
 0x220   : > { %v1350_v50 = vpop.f32.mrf.mxu1  ;;  %952 = vmax.xlane.f32.xlu1 %v933_v49 }
 0x221   : > { %v1771_v51 = vadd.f32 %v1349_v48, %v1743_v28 }
 0x222   : > { %v1351_v52 = vpop.f32.mrf.mxu1 }
 0x223   : > { %v1352_v53 = vadd.f32 %v1351_v52, %v1350_v50  ;;  %v934_v54 = vsel %vm929_vm0, %v1771_v51, -1e+30 }
 0x224   : > { %v1353_v55 = vpop.f32.mrf.mxu1  ;;  %954 = vmax.xlane.f32.xlu0 %v934_v54 }
 0x225   : > { %v1777_v56 = vadd.f32 %v1352_v53, %v1743_v28 }
 0x226   : > { %v1354_v57 = vpop.f32.mrf.mxu1 }
 0x227   : > { %v1355_v58 = vadd.f32 %v1354_v57, %v1353_v55  ;;  %v935_v59 = vsel %vm929_vm0, %v1777_v56, -1e+30 }
 0x228   : > { %v1356_v60 = vpop.f32.mrf.mxu1  ;;  %956 = vmax.xlane.f32.xlu1 %v935_v59 }
 0x229   : > { %v1783_v61 = vadd.f32 %v1355_v58, %v1743_v28 }
 0x22a   : > { %v1357_v62 = vpop.f32.mrf.mxu1 }
 0x22b   : > { %v1358_v63 = vadd.f32 %v1357_v62, %v1356_v60  ;;  %v936_v0 = vsel %vm929_vm0, %v1783_v61, -1e+30 }
 0x22c   : > { %v1359_v1 = vpop.f32.mrf.mxu1  ;;  %958 = vmax.xlane.f32.xlu0 %v936_v0 }
 0x22d   : > { %v1789_v2 = vadd.f32 %v1358_v63, %v1743_v28 }
 0x22e   : > { %v1360_v3 = vpop.f32.mrf.mxu1 }
 0x22f   : > { %v1361_v4 = vadd.f32 %v1360_v3, %v1359_v1  ;;  %v937_v5 = vsel %vm929_vm0, %v1789_v2, -1e+30 }
 0x230   : > { %v1362_v6 = vpop.f32.mrf.mxu1  ;;  %960 = vmax.xlane.f32.xlu1 %v937_v5 }
 0x231   : > { %v1795_v7 = vadd.f32 %v1361_v4, %v1743_v28 }
 0x232   : > { %v1363_v8 = vpop.f32.mrf.mxu1 }
 0x233   : > { %v1364_v9 = vadd.f32 %v1363_v8, %v1362_v6  ;;  %v938_v10 = vsel %vm929_vm0, %v1795_v7, -1e+30 }
 0x234   : > { %v1365_v11 = vpop.f32.mrf.mxu1  ;;  %962 = vmax.xlane.f32.xlu0 %v938_v10 }
 0x235   : > { %v1801_v12 = vadd.f32 %v1364_v9, %v1743_v28 }
 0x236   : > { %v1366_v13 = vpop.f32.mrf.mxu1 }
 0x237   : > { %v1367_v14 = vadd.f32 %v1366_v13, %v1365_v11  ;;  %v939_v15 = vsel %vm929_vm0, %v1801_v12, -1e+30 }
 0x238   : > { %v1368_v16 = vpop.f32.mrf.mxu1  ;;  %964 = vmax.xlane.f32.xlu1 %v939_v15 }
 0x239   : > { %v1807_v17 = vadd.f32 %v1367_v14, %v1743_v28 }
 0x23a   : > { %v1369_v18 = vpop.f32.mrf.mxu1 }
 0x23b   : > { %v1370_v19 = vadd.f32 %v1369_v18, %v1368_v16  ;;  %v940_v20 = vsel %vm929_vm0, %v1807_v17, -1e+30 }
 0x23c   : > { %v1371_v21 = vpop.f32.mrf.mxu1  ;;  %966 = vmax.xlane.f32.xlu0 %v940_v20 }
 0x23d   : > { %v1813_v22 = vadd.f32 %v1370_v19, %v1743_v28 }
 0x23e   : > { %v1372_v23 = vpop.f32.mrf.mxu1 }
 0x23f   : > { %v1373_v24 = vadd.f32 %v1372_v23, %v1371_v21  ;;  %v941_v25 = vsel %vm929_vm0, %v1813_v22, -1e+30 }
 0x240   : > { %v1374_v27 = vpop.f32.mrf.mxu1  ;;  %968 = vmax.xlane.f32.xlu1 %v941_v25 }
 0x241   : > { %v1819_v29 = vadd.f32 %v1373_v24, %v1743_v28 }
 0x242   : > { %v1375_v30 = vpop.f32.mrf.mxu1 }
 0x243   : > { %v1376_v32 = vadd.f32 %v1375_v30, %v1374_v27  ;;  %v942_v33 = vsel %vm929_vm0, %v1819_v29, -1e+30 }
 0x244   : > { %v1377_v34 = vpop.f32.mrf.mxu1  ;;  %970 = vmax.xlane.f32.xlu0 %v942_v33 }
 0x245   : > { %v1825_v35 = vadd.f32 %v1376_v32, %v1743_v28 }
 0x246   : > { %v1378_v37 = vpop.f32.mrf.mxu1 }
 0x247   : > { %v1379_v38 = vadd.f32 %v1378_v37, %v1377_v34  ;;  %v943_v39 = vsel %vm929_vm0, %v1825_v35, -1e+30 }
 0x248   : > { %v1380_v40 = vpop.f32.mrf.mxu1  ;;  %972 = vmax.xlane.f32.xlu1 %v943_v39 }
 0x249   : > { %v1831_v42 = vadd.f32 %v1379_v38, %v1743_v28 }
 0x24a   : > { %v1381_v43 = vpop.f32.mrf.mxu1 }
 0x24b   : > { %v1382_v44 = vadd.f32 %v1381_v43, %v1380_v40  ;;  %v944_v45 = vsel %vm929_vm0, %v1831_v42, -1e+30 }
 0x24c   : > { %974 = vmax.xlane.f32.xlu0 %v944_v45 }
 0x24d   : > { %v1837_v47 = vadd.f32 %v1382_v44, %v1743_v28 }
 0x24f   : > { %v945_v48 = vsel %vm929_vm0, %v1837_v47, -1e+30 }
 0x250   : > { %976 = vmax.xlane.f32.xlu1 %v945_v48 }
 0x29d   : > { %v947_v49 = vpop.xlane.xlu0 %946 }
 0x29e   : > { %v1843_v50 = vsub.f32 %v1747_v31, %v947_v49 }
 0x2a0   : > { %v994_v52 = vmul.f32 1.442695, %v1843_v50 }
 0x2a1   : > { %v949_v53 = vpop.xlane.xlu0 %948 }
 0x2a2   : > { %1503 = vpow2.f32 %v994_v52  ;;  %v1847_v54 = vsub.f32 %v1753_v36, %v949_v53 }
 0x2a4   : > { %v996_v55 = vmul.f32 1.442695, %v1847_v54 }
 0x2a5   : > { %v951_v28 = vpop.xlane.xlu1 %950 }
 0x2a6   : > { %1505 = vpow2.f32 %v996_v55  ;;  %v1851_v57 = vsub.f32 %v1759_v41, %v951_v28 }
 0x2a8   : > { %v998_v58 = vmul.f32 1.442695, %v1851_v57 }
 0x2a9   : > { %v953_v59 = vpop.xlane.xlu1 %952 }
 0x2aa   : > { %1507 = vpow2.f32 %v998_v58  ;;  %v1855_v31 = vsub.f32 %v1765_v46, %v953_v59 }
 0x2ac   : > { %v1000_v60 = vmul.f32 1.442695, %v1855_v31 }
 0x2ad   : > { %v955_v62 = vpop.xlane.xlu0 %954 }
 0x2ae   : > { %1509 = vpow2.f32 %v1000_v60  ;;  %v1859_v36 = vsub.f32 %v1771_v51, %v955_v62 }
 0x2af   : > { %v1504_v63 = vpop.eup %1503 }
 0x2b0   : > { %v1002_v0 = vmul.f32 1.442695, %v1859_v36  ;;  %v1026_v41 = vsel %vm929_vm0, %v1504_v63, 0.0 }
 0x2b1   : > { %v957_v1 = vpop.xlane.xlu1 %956  ;;  %1042 = vadd.xlane.f32.xlu0 %v1026_v41 }
 0x2b2   : > { %1511 = vpow2.f32 %v1002_v0  ;;  %v1865_v3 = vsub.f32 %v1777_v56, %v957_v1 }
 0x2b3   : > { %v1506_v46 = vpop.eup %1505 }
 0x2b4   : > { %v1004_v4 = vmul.f32 1.442695, %v1865_v3  ;;  %v1027_v5 = vsel %vm929_vm0, %v1506_v46, 0.0 }
 0x2b5   : > { %1044 = vadd.xlane.f32.xlu1 %v1027_v5  ;;  %v959_v51 = vpop.xlane.xlu0 %958 }
 0x2b6   : > { %1513 = vpow2.f32 %v1004_v4  ;;  %v1871_v6 = vsub.f32 %v1783_v61, %v959_v51 }
 0x2b7   : > { %v1508_v8 = vpop.eup %1507 }
 0x2b8   : > { %v1006_v9 = vmul.f32 1.442695, %v1871_v6  ;;  %v1028_v10 = vsel %vm929_vm0, %v1508_v8, 0.0 }
 0x2b9   : > { %v961_v56 = vpop.xlane.xlu1 %960  ;;  %1046 = vadd.xlane.f32.xlu0 %v1028_v10 }
 0x2ba   : > { %1515 = vpow2.f32 %v1006_v9  ;;  %v1877_v11 = vsub.f32 %v1789_v2, %v961_v56 }
 0x2bb   : > { %v1510_v13 = vpop.eup %1509 }
 0x2bc   : > { %v1008_v14 = vmul.f32 1.442695, %v1877_v11  ;;  %v1029_v15 = vsel %vm929_vm0, %v1510_v13, 0.0 }
 0x2bd   : > { %1048 = vadd.xlane.f32.xlu1 %v1029_v15  ;;  %v963_v61 = vpop.xlane.xlu0 %962 }
 0x2be   : > { %1517 = vpow2.f32 %v1008_v14  ;;  %v1883_v16 = vsub.f32 %v1795_v7, %v963_v61 }
 0x2bf   : > { %v1512_v18 = vpop.eup %1511 }
 0x2c0   : > { %v1010_v19 = vmul.f32 1.442695, %v1883_v16  ;;  %v1030_v20 = vsel %vm929_vm0, %v1512_v18, 0.0 }
 0x2c1   : > { %v965_v2 = vpop.xlane.xlu1 %964  ;;  %1050 = vadd.xlane.f32.xlu0 %v1030_v20 }
 0x2c2   : > { %1519 = vpow2.f32 %v1010_v19  ;;  %v1889_v21 = vsub.f32 %v1801_v12, %v965_v2 }
 0x2c3   : > { %v1514_v23 = vpop.eup %1513 }
 0x2c4   : > { %v1012_v24 = vmul.f32 1.442695, %v1889_v21  ;;  %v1031_v25 = vsel %vm929_vm0, %v1514_v23, 0.0 }
 0x2c5   : > { %1052 = vadd.xlane.f32.xlu1 %v1031_v25  ;;  %v967_v7 = vpop.xlane.xlu0 %966 }
 0x2c6   : > { %1521 = vpow2.f32 %v1012_v24  ;;  %v1895_v27 = vsub.f32 %v1807_v17, %v967_v7 }
 0x2c7   : > { %v1516_v30 = vpop.eup %1515 }
 0x2c8   : > { %v1014_v32 = vmul.f32 1.442695, %v1895_v27  ;;  %v1032_v33 = vsel %vm929_vm0, %v1516_v30, 0.0 }
 0x2c9   : > { %v969_v12 = vpop.xlane.xlu1 %968  ;;  %1054 = vadd.xlane.f32.xlu0 %v1032_v33 }
 0x2ca   : > { %1523 = vpow2.f32 %v1014_v32  ;;  %v1901_v34 = vsub.f32 %v1813_v22, %v969_v12 }
 0x2cb   : > { %v1518_v37 = vpop.eup %1517 }
 0x2cc   : > { %v1016_v38 = vmul.f32 1.442695, %v1901_v34  ;;  %v1033_v39 = vsel %vm929_vm0, %v1518_v37, 0.0 }
 0x2cd   : > { %1056 = vadd.xlane.f32.xlu1 %v1033_v39  ;;  %v971_v17 = vpop.xlane.xlu0 %970 }
 0x2ce   : > { %1525 = vpow2.f32 %v1016_v38  ;;  %v1907_v40 = vsub.f32 %v1819_v29, %v971_v17 }
 0x2cf   : > { %v1520_v43 = vpop.eup %1519 }
 0x2d0   : > { %v1018_v44 = vmul.f32 1.442695, %v1907_v40  ;;  %v1034_v45 = vsel %vm929_vm0, %v1520_v43, 0.0 }
 0x2d1   : > { %v973_v22 = vpop.xlane.xlu1 %972  ;;  %1058 = vadd.xlane.f32.xlu0 %v1034_v45 }
 0x2d2   : > { %1527 = vpow2.f32 %v1018_v44  ;;  %v1913_v48 = vsub.f32 %v1825_v35, %v973_v22 }
 0x2d3   : > { %v1522_v49 = vpop.eup %1521 }
 0x2d4   : > { %v1020_v52 = vmul.f32 1.442695, %v1913_v48  ;;  %v1035_v53 = vsel %vm929_vm0, %v1522_v49, 0.0 }
 0x2d5   : > { %1060 = vadd.xlane.f32.xlu1 %v1035_v53  ;;  %v975_v29 = vpop.xlane.xlu0 %974 }
 0x2d6   : > { %1529 = vpow2.f32 %v1020_v52  ;;  %v1919_v55 = vsub.f32 %v1831_v42, %v975_v29 }
 0x2d7   : > { %v1524_v28 = vpop.eup %1523 }
 0x2d8   : > { %v1022_v58 = vmul.f32 1.442695, %v1919_v55  ;;  %v1036_v59 = vsel %vm929_vm0, %v1524_v28, 0.0 }
 0x2d9   : > { %v977_v35 = vpop.xlane.xlu1 %976  ;;  %1062 = vadd.xlane.f32.xlu0 %v1036_v59 }
 0x2da   : > { %1531 = vpow2.f32 %v1022_v58  ;;  %v1925_v60 = vsub.f32 %v1837_v47, %v977_v35 }
 0x2db   : > { %v1526_v62 = vpop.eup %1525 }
 0x2dc   : > { %v1024_v63 = vmul.f32 1.442695, %v1925_v60  ;;  %v1037_v0 = vsel %vm929_vm0, %v1526_v62, 0.0 }
 0x2dd   : > { %1064 = vadd.xlane.f32.xlu1 %v1037_v0 }
 0x2de   : > { %1533 = vpow2.f32 %v1024_v63 }
 0x2df   : > { %v1528_v42 = vpop.eup %1527 }
 0x2e0   : > { %v1038_v41 = vsel %vm929_vm0, %v1528_v42, 0.0 }
 0x2e1   : > { %1066 = vadd.xlane.f32.xlu0 %v1038_v41 }
 0x2e3   : > { %v1530_v1 = vpop.eup %1529 }
 0x2e4   : > { %v1039_v46 = vsel %vm929_vm0, %v1530_v1, 0.0 }
 0x2e5   : > { %1068 = vadd.xlane.f32.xlu1 %v1039_v46 }
 0x2e7   : > { %v1532_v47 = vpop.eup %1531 }
 0x2e8   : > { %v1040_v4 = vsel %vm929_vm0, %v1532_v47, 0.0 }
 0x2e9   : > { %1070 = vadd.xlane.f32.xlu0 %v1040_v4 }
 0x2eb   : > { %v1534_v5 = vpop.eup %1533 }
 0x2ec   : > { %v1041_v51 = vsel %vm929_vm0, %v1534_v5, 0.0 }
 0x2ed   : > { %1072 = vadd.xlane.f32.xlu1 %v1041_v51 }
 0x33a   : > { %v1043_v8 = vpop.xlane.xlu0 %1042 }
 0x33b   : > { %1535 = vlog2.f32 %v1043_v8 }
 0x33e   : > { %v1045_v9 = vpop.xlane.xlu1 %1044 }
 0x33f   : > { %1537 = vlog2.f32 %v1045_v9 }
 0x342   : > { %v1047_v10 = vpop.xlane.xlu0 %1046 }
 0x343   : > { %1539 = vlog2.f32 %v1047_v10 }
 0x346   : > { %v1049_v56 = vpop.xlane.xlu1 %1048 }
 0x347   : > { %1541 = vlog2.f32 %v1049_v56 }
 0x348   : > { %v1536_v13 = vpop.eup %1535 }
 0x349   : > { %v1075_v14 = vmul.f32 0.6931472, %v1536_v13 }
 0x34a   : > { %v1051_v15 = vpop.xlane.xlu0 %1050 }
 0x34b   : > { %v1106_v61 = vsub.f32 %v1843_v50, %v1075_v14  ;;  %1543 = vlog2.f32 %v1051_v15 }
 0x34c   : > { %v1538_v18 = vpop.eup %1537 }
 0x34d   : > { %v1122_v19 = vsel %vm929_vm0, %v1106_v61, 0.0  ;;  %v1077_v20 = vmul.f32 0.6931472, %v1538_v18 }
 0x34e   : > { %1138 = vst [vmem:[%s1943_s5] sm:$0xff] %v1122_v19  ;;  %v1053_v2 = vpop.xlane.xlu1 %1052 }
 0x34f   : > { %v1107_v23 = vsub.f32 %v1847_v54, %v1077_v20  ;;  %1545 = vlog2.f32 %v1053_v2 }
 0x350   : > { %v1540_v24 = vpop.eup %1539 }
 0x351   : > { %v1123_v25 = vsel %vm929_vm0, %v1107_v23, 0.0  ;;  %v1079_v7 = vmul.f32 0.6931472, %v1540_v24 }
 0x352   : > { %1139 = vst [vmem:[%s1943_s5 + $0x8] sm:$0xff] %v1123_v25  ;;  %v1055_v50 = vpop.xlane.xlu0 %1054 }
 0x353   : > { %v1108_v30 = vsub.f32 %v1851_v57, %v1079_v7  ;;  %1547 = vlog2.f32 %v1055_v50 }
 0x354   : > { %v1542_v32 = vpop.eup %1541 }
 0x355   : > { %v1124_v33 = vsel %vm929_vm0, %v1108_v30, 0.0  ;;  %v1081_v12 = vmul.f32 0.6931472, %v1542_v32 }
 0x356   : > { %1140 = vst [vmem:[%s1943_s5 + $0x10] sm:$0xff] %v1124_v33  ;;  %v1057_v54 = vpop.xlane.xlu1 %1056 }
 0x357   : > { %v1109_v37 = vsub.f32 %v1855_v31, %v1081_v12  ;;  %1549 = vlog2.f32 %v1057_v54 }
 0x358   : > { %v1544_v38 = vpop.eup %1543 }
 0x359   : > { %v1125_v39 = vsel %vm929_vm0, %v1109_v37, 0.0  ;;  %v1083_v17 = vmul.f32 0.6931472, %v1544_v38 }
 0x35a   : > { %1141 = vst [vmem:[%s1943_s5 + $0x18] sm:$0xff] %v1125_v39  ;;  %v1059_v57 = vpop.xlane.xlu0 %1058 }
 0x35b   : > { %v1110_v43 = vsub.f32 %v1859_v36, %v1083_v17  ;;  %1551 = vlog2.f32 %v1059_v57 }
 0x35c   : > { %v1546_v44 = vpop.eup %1545 }
 0x35d   : > { %v1126_v45 = vsel %vm929_vm0, %v1110_v43, 0.0  ;;  %v1085_v22 = vmul.f32 0.6931472, %v1546_v44 }
 0x35e   : > { %1142 = vst [vmem:[%s1943_s5 + $0x20] sm:$0xff] %v1126_v45  ;;  %v1061_v31 = vpop.xlane.xlu1 %1060 }
 0x35f   : > { %v1111_v49 = vsub.f32 %v1865_v3, %v1085_v22  ;;  %1553 = vlog2.f32 %v1061_v31 }
 0x360   : > { %v1548_v52 = vpop.eup %1547 }
 0x361   : > { %v1127_v53 = vsel %vm929_vm0, %v1111_v49, 0.0  ;;  %v1087_v29 = vmul.f32 0.6931472, %v1548_v52 }
 0x362   : > { %1143 = vst [vmem:[%s1943_s5 + $0x28] sm:$0xff] %v1127_v53  ;;  %v1063_v36 = vpop.xlane.xlu0 %1062 }
 0x363   : > { %v1112_v28 = vsub.f32 %v1871_v6, %v1087_v29  ;;  %1555 = vlog2.f32 %v1063_v36 }
 0x364   : > { %v1550_v58 = vpop.eup %1549 }
 0x365   : > { %v1128_v59 = vsel %vm929_vm0, %v1112_v28, 0.0  ;;  %v1089_v35 = vmul.f32 0.6931472, %v1550_v58 }
 0x366   : > { %1144 = vst [vmem:[%s1943_s5 + $0x30] sm:$0xff] %v1128_v59  ;;  %v1065_v3 = vpop.xlane.xlu1 %1064 }
 0x367   : > { %v1113_v62 = vsub.f32 %v1877_v11, %v1089_v35  ;;  %1557 = vlog2.f32 %v1065_v3 }
 0x368   : > { %v1552_v63 = vpop.eup %1551 }
 0x369   : > { %v1129_v0 = vsel %vm929_vm0, %v1113_v62, 0.0  ;;  %v1091_v42 = vmul.f32 0.6931472, %v1552_v63 }
 0x36a   : > { %1145 = vst [vmem:[%s1943_s5 + $0x38] sm:$0xff] %v1129_v0  ;;  %v1067_v6 = vpop.xlane.xlu0 %1066 }
 0x36b   : > { %v1114_v41 = vsub.f32 %v1883_v16, %v1091_v42  ;;  %1559 = vlog2.f32 %v1067_v6 }
 0x36c   : > { %v1554_v1 = vpop.eup %1553 }
 0x36d   : > { %v1130_v46 = vsel %vm929_vm0, %v1114_v41, 0.0  ;;  %v1093_v47 = vmul.f32 0.6931472, %v1554_v1 }
 0x36e   : > { %1146 = vst [vmem:[%s1943_s5 + $0x40] sm:$0xff] %v1130_v46  ;;  %v1069_v11 = vpop.xlane.xlu1 %1068 }
 0x36f   : > { %v1115_v4 = vsub.f32 %v1889_v21, %v1093_v47  ;;  %1561 = vlog2.f32 %v1069_v11 }
 0x370   : > { %v1556_v5 = vpop.eup %1555 }
 0x371   : > { %v1131_v51 = vsel %vm929_vm0, %v1115_v4, 0.0  ;;  %v1095_v8 = vmul.f32 0.6931472, %v1556_v5 }
 0x372   : > { %1147 = vst [vmem:[%s1943_s5 + $0x48] sm:$0xff] %v1131_v51  ;;  %v1071_v16 = vpop.xlane.xlu0 %1070 }
 0x373   : > { %v1116_v9 = vsub.f32 %v1895_v27, %v1095_v8  ;;  %1563 = vlog2.f32 %v1071_v16 }
 0x374   : > { %v1558_v10 = vpop.eup %1557 }
 0x375   : > { %v1132_v56 = vsel %vm929_vm0, %v1116_v9, 0.0  ;;  %v1097_v13 = vmul.f32 0.6931472, %v1558_v10 }
 0x376   : > { %1148 = vst [vmem:[%s1943_s5 + $0x50] sm:$0xff] %v1132_v56  ;;  %v1073_v21 = vpop.xlane.xlu1 %1072 }
 0x377   : > { %v1117_v14 = vsub.f32 %v1901_v34, %v1097_v13  ;;  %1565 = vlog2.f32 %v1073_v21 }
 0x378   : > { %v1560_v15 = vpop.eup %1559 }
 0x379   : > { %v1133_v61 = vsel %vm929_vm0, %v1117_v14, 0.0  ;;  %v1099_v18 = vmul.f32 0.6931472, %v1560_v15 }
 0x37a   : > { %1149 = vst [vmem:[%s1943_s5 + $0x58] sm:$0xff] %v1133_v61 }
 0x37b   : > { %v1118_v27 = vsub.f32 %v1907_v40, %v1099_v18 }
 0x37c   : > { %v1562_v19 = vpop.eup %1561 }
 0x37d   : > { %v1134_v20 = vsel %vm929_vm0, %v1118_v27, 0.0  ;;  %v1101_v2 = vmul.f32 0.6931472, %v1562_v19 }
 0x37e   : > { %1150 = vst [vmem:[%s1943_s5 + $0x60] sm:$0xff] %v1134_v20 }
 0x37f   : > { %v1119_v23 = vsub.f32 %v1913_v48, %v1101_v2 }
 0x380   : > { %v1564_v34 = vpop.eup %1563 }
 0x381   : > { %v1135_v24 = vsel %vm929_vm0, %v1119_v23, 0.0  ;;  %v1103_v25 = vmul.f32 0.6931472, %v1564_v34 }
 0x382   : > { %1151 = vst [vmem:[%s1943_s5 + $0x68] sm:$0xff] %v1135_v24 }
 0x383   : > { %v1120_v7 = vsub.f32 %v1919_v55, %v1103_v25 }
 0x384   : > { %v1566_v50 = vpop.eup %1565 }
 0x385   : > { %v1136_v40 = vsel %vm929_vm0, %v1120_v7, 0.0  ;;  %v1105_v30 = vmul.f32 0.6931472, %v1566_v50 }
 0x386   : > { %1152 = vst [vmem:[%s1943_s5 + $0x70] sm:$0xff] %v1136_v40 }
 0x387   : > { %v1121_v32 = vsub.f32 %v1925_v60, %v1105_v30 }
 0x389   : > { %v1137_v33 = vsel %vm929_vm0, %v1121_v32, 0.0 }
 0x38a   : > { %1153 = vst [vmem:[%s1943_s5 + $0x78] sm:$0xff] %v1137_v33 }
 0x38b PF: > { %s14_s17 = sadd.s32 1, %s1589_s17   ;;  %s2023_s15 = smov %s1585_s16 }
 0x38c   : > { %p11_p5 = scmp.ge.s32.totalorder %s14_s17, 4   ;;  %s2024_s16 = smov %s2026_s18 }
 0x38e   :  { %13 = sbr.rel (!%p11_p5) target bundleno = 2 (0x2), region = 77 }

</bundles_post_ra>
